<compile_context>
chip_gen: v6e
topology: v6e:2x2x1
jax: 0.10.0
libtpu: 0.0.40
codegen_flags: <defaults>
</compile_context>

<pallas_src>
import functools

import jax
import jax.numpy as jnp
from jax.experimental import pallas as pl
from jax.experimental.pallas import tpu as pltpu  # noqa: F401  (TPU backend)


# ----------------------------------------------------------------------------
# Fused Pallas kernel
# ----------------------------------------------------------------------------
def _full_spec(shape):
    # Whole-array block (full-extent blocks are exempt from (8,128) tiling).
    return pl.BlockSpec(shape, lambda: (0,) * len(shape))


def _cnn_fused_kernel(x3_ref, m1_ref, b1_ref, rs1_ref, cs1_ref,
                      m2_ref, b2_ref, rs2_ref, wfc_ref, fcb_ref,
                      out_ref, *, c1, c2):
    f32 = jnp.float32
    B = out_ref.shape[0]

    # ---- conv1 + bias + ReLU : single GEMM over row-im2col'd input ---------
    o1 = jnp.dot(x3_ref[...], m1_ref[...], preferred_element_type=f32)
    o1 = jnp.maximum(o1 + b1_ref[...], 0.0)                   # [B*30, 30*8]

    # ---- pool1 : pairwise maxes + 0/1 column-selection matmul --------------
    cm1 = jnp.maximum(o1[:, :-c1], o1[:, c1:])                 # cols w', w'+1
    rm1 = jnp.maximum(cm1[:-1, :], cm1[1:, :])                 # rows r, r+1
    p1c = jnp.dot(rm1, cs1_ref[...], preferred_element_type=f32)   # [B*30-1, 128]

    # ---- conv2 + bias + ReLU : row taps via ONE stacked selection GEMM -----
    a_all = jnp.dot(rs1_ref[...], p1c, preferred_element_type=f32)  # [3*B*16, 128]
    r2 = a_all.shape[0] // 3                                   # B*16 (tile-aligned)
    o2 = jnp.dot(a_all[0:r2], m2_ref[0], preferred_element_type=f32)
    o2 = o2 + jnp.dot(a_all[r2:2 * r2], m2_ref[1], preferred_element_type=f32)
    o2 = o2 + jnp.dot(a_all[2 * r2:3 * r2], m2_ref[2], preferred_element_type=f32)
    o2 = jnp.maximum(o2 + b2_ref[...], 0.0)                    # [B*16, 16*16]

    # ---- pool2 : pairwise maxes (selection is folded into fc weights) ------
    cm2 = jnp.maximum(o2[:, :-c2], o2[:, c2:])
    rm2 = jnp.maximum(cm2[:-1, :], cm2[1:, :])                 # [B*16-1, 240]

    # ---- fc1 : sum over pooled rows (ho) of selected rows @ folded weights -
    acc = jnp.zeros(out_ref.shape, f32) + fcb_ref[...]
    n_ho = wfc_ref.shape[0]
    for ho in range(n_ho):
        sel = rs2_ref[B * ho:B * ho + B, :]                    # [B, B*16-1]
        g = jnp.dot(sel, rm2, preferred_element_type=f32)      # [B, 240]
        acc = acc + jnp.dot(g, wfc_ref[ho], preferred_element_type=f32)
    out_ref[...] = acc.astype(out_ref.dtype)


# ----------------------------------------------------------------------------
# Wrapper: build structured operands (trace-time / tiny XLA ops) + pallas_call
# ----------------------------------------------------------------------------
def _banded_conv_mats(k, wp):
    """k: [Cout, Cin, 3, 3] torch conv weight -> [3, wp*Cin, wp*Cout] banded."""
    mats = []
    for kh in range(3):
        m = jnp.zeros((wp * k.shape[1], wp * k.shape[0]), jnp.float32)
        for kw in range(3):
            m = m + jnp.kron(jnp.eye(wp, k=-(kw - 1), dtype=jnp.float32),
                             k[:, :, kh, kw].T)
        mats.append(m)
    return jnp.stack(mats)


_NC_PAD = 128   # lane-dense fc output / folded fc weights


def _prep_operands(x, params):
    B, Cin, H, W = x.shape
    if H != 28 or W != 28:
        raise ValueError("CNN.fc1 expects 28x28 inputs (16*7*7 features).")
    C1, C2 = 8, 16
    HP1 = WP1 = 30          # 28 + 2 padding
    HP2 = WP2 = 16          # 14 + 2 padding
    NP1, NP2 = 14, 7        # pooled spatial sizes
    f32 = jnp.float32

    # Input -> row-flat padded layout [B*30, 30*Cin], plus one zero row at each
    # flat end; then row-im2col the three kh taps into the lane dim so conv1 is
    # a single GEMM inside the kernel.
    x_nhwc = jnp.transpose(x, (0, 2, 3, 1)).astype(f32)
    x_pad = jnp.pad(x_nhwc, ((0, 0), (1, 1), (1, 1), (0, 0)))
    x_flat = x_pad.reshape(B * HP1, WP1 * Cin)
    x0e = jnp.pad(x_flat, ((1, 1), (0, 0)))
    r1 = B * HP1
    x3 = jnp.concatenate(
        [x0e[0:r1], x0e[1:r1 + 1], x0e[2:r1 + 2]], axis=1)     # [B*30, 3*30*Cin]

    m1 = _banded_conv_mats(params["conv1_w"].astype(f32), WP1)  # [3, 30*Cin, 240]
    m1cat = m1.reshape(3 * WP1 * Cin, WP1 * C1)                 # vstack of the taps
    b1 = jnp.tile(params["conv1_b"].astype(f32), WP1)[None, :]  # [1, 240]
    m2 = _banded_conv_mats(params["conv2_w"].astype(f32), WP2)  # [3, 128, 256]
    b2 = jnp.tile(params["conv2_b"].astype(f32), WP2)[None, :]  # [1, 256]

    # pool1 row selection (picks rows b*30 + 2ho + 1 of the row-maxed array and
    # writes them at padded rows b*16 + ho + 1); shifted copies provide conv2's
    # kh = -1/0/+1 row taps with correct zero padding.  Stacked into a single
    # [3*B*16, B*30-1] matrix so the kernel needs only one selection GEMM.
    rs1 = jnp.zeros((B * HP2, B * HP1 - 1), f32)
    b_i = jnp.repeat(jnp.arange(B), NP1)
    ho_i = jnp.tile(jnp.arange(NP1), B)
    rs1 = rs1.at[b_i * HP2 + ho_i + 1, b_i * HP1 + 2 * ho_i + 1].set(1.0)
    zrow = jnp.zeros((1, B * HP1 - 1), f32)
    rs1s = jnp.stack([
        jnp.concatenate([zrow, rs1[:-1]], axis=0),   # tap kh = -1
        rs1,                                         # tap kh =  0
        jnp.concatenate([rs1[1:], zrow], axis=0),    # tap kh = +1
    ])
    rs1cat = rs1s.reshape(3 * B * HP2, B * HP1 - 1)

    # pool1 column selection: col (2wo+1)*8 + c -> (wo+1)*8 + c, pads -> 0.
    cs1 = jnp.zeros(((WP1 - 1) * C1, WP2 * C1), f32)
    wo_i = jnp.repeat(jnp.arange(NP1), C1)
    c_i = jnp.tile(jnp.arange(C1), NP1)
    cs1 = cs1.at[(2 * wo_i + 1) * C1 + c_i, (wo_i + 1) * C1 + c_i].set(1.0)

    # pool2 row selection, ordered ho-major / batch-minor.
    rs2 = jnp.zeros((NP2 * B, B * HP2 - 1), f32)
    ho2_i = jnp.repeat(jnp.arange(NP2), B)
    b2_i = jnp.tile(jnp.arange(B), NP2)
    rs2 = rs2.at[ho2_i * B + b2_i, b2_i * HP2 + 2 * ho2_i + 1].set(1.0)

    # fc1: fold torch NCHW flatten order + pool2 column selection into weights,
    # then pad the class dim to 128 lanes (lane-dense GEMM + unmasked store).
    nc = params["fc1_b"].shape[0]
    wfc = params["fc1_w"].astype(f32).reshape(nc, C2, NP2, NP2)
    wfc = jnp.transpose(wfc, (2, 3, 1, 0))                      # [ho, wo, c, n]
    col_idx = ((2 * jnp.arange(NP2) + 1)[:, None] * C2
               + jnp.arange(C2)[None, :]).reshape(-1)           # [7*16]
    wfc_prep = jnp.zeros((NP2, (WP2 - 1) * C2, nc), f32)
    wfc_prep = wfc_prep.at[:, col_idx, :].set(wfc.reshape(NP2, NP2 * C2, nc))
    wfc_prep = jnp.pad(wfc_prep, ((0, 0), (0, 0), (0, _NC_PAD - nc)))
    fcb = jnp.pad(params["fc1_b"].astype(f32), (0, _NC_PAD - nc))[None, :]

    return (x3, m1cat, b1, rs1cat, cs1, m2, b2, rs2, wfc_prep, fcb)


def cnn_forward(x, params):
    B = x.shape[0]
    nc = params["fc1_b"].shape[0]
    ops = _prep_operands(x, params)
    kern = functools.partial(_cnn_fused_kernel, c1=8, c2=16)
    out_padded = pl.pallas_call(
        kern,
        out_shape=jax.ShapeDtypeStruct((B, _NC_PAD), jnp.float32),
        in_specs=[_full_spec(a.shape) for a in ops],
        out_specs=_full_spec((B, _NC_PAD)),
    )(*ops)
    return out_padded[:, :nc]


# ----------------------------------------------------------------------------
# Pure-JAX reference (for sanity check)
# ----------------------------------------------------------------------------
def ref_forward(x, params):
    dn = ("NCHW", "OIHW", "NCHW")
    y = jax.lax.conv_general_dilated(
        x, params["conv1_w"], (1, 1), "SAME", dimension_numbers=dn
    )
    y = jax.nn.relu(y + params["conv1_b"][None, :, None, None])
    y = jax.lax.reduce_window(
        y, -jnp.inf, jax.lax.max, (1, 1, 2, 2), (1, 1, 2, 2), "VALID"
    )
    y = jax.lax.conv_general_dilated(
        y, params["conv2_w"], (1, 1), "SAME", dimension_numbers=dn
    )
    y = jax.nn.relu(y + params["conv2_b"][None, :, None, None])
    y = jax.lax.reduce_window(
        y, -jnp.inf, jax.lax.max, (1, 1, 2, 2), (1, 1, 2, 2), "VALID"
    )
    flat = y.reshape(y.shape[0], -1)
    return flat @ params["fc1_w"].T + params["fc1_b"]


# ----------------------------------------------------------------------------
# Deterministic parameter init + main
# ----------------------------------------------------------------------------
def init_params(key, in_channels=1, num_classes=10):
    ks = jax.random.split(key, 6)

    def u(k, shape, fan_in):
        bound = 1.0 / jnp.sqrt(fan_in)
        return jax.random.uniform(k, shape, jnp.float32, -bound, bound)

    return {
        "conv1_w": u(ks[0], (8, in_channels, 3, 3), in_channels * 9),
        "conv1_b": u(ks[1], (8,), in_channels * 9),
        "conv2_w": u(ks[2], (16, 8, 3, 3), 8 * 9),
        "conv2_b": u(ks[3], (16,), 8 * 9),
        "fc1_w": u(ks[4], (num_classes, 16 * 7 * 7), 16 * 7 * 7),
        "fc1_b": u(ks[5], (num_classes,), 16 * 7 * 7),
    }


if __name__ == "__main__":
    key = jax.random.PRNGKey(0)
    k_x, k_p = jax.random.split(key)
    # fc1 expects 16*7*7 features => input spatial must be 28x28 (MNIST-style).
    B, C_in, H, W = 2, 1, 28, 28
    x = jax.random.normal(k_x, (B, C_in, H, W), jnp.float32)
    params = init_params(k_p, in_channels=C_in, num_classes=10)

    fwd = jax.jit(cnn_forward)
    out = jax.block_until_ready(fwd(x, params))
    assert out.shape == (B, 10), out.shape

    ref = jax.block_until_ready(ref_forward(x, params))
    max_err = float(jnp.max(jnp.abs(out - ref)))
    assert jnp.allclose(out, ref, rtol=2e-4, atol=2e-4), max_err
    print("KERNEL_OK")
</pallas_src>

<mosaic_0001>
module attributes {stable_mosaic.version = 11 : i64} {
  func.func @_cnn_fused_kernel(%arg0: memref<60x90xf32, #tpu.memory_space<vmem>>, %arg1: memref<90x240xf32, #tpu.memory_space<vmem>>, %arg2: memref<1x240xf32, #tpu.memory_space<vmem>>, %arg3: memref<96x59xf32, #tpu.memory_space<vmem>>, %arg4: memref<232x128xf32, #tpu.memory_space<vmem>>, %arg5: memref<3x128x256xf32, #tpu.memory_space<vmem>>, %arg6: memref<1x256xf32, #tpu.memory_space<vmem>>, %arg7: memref<14x31xf32, #tpu.memory_space<vmem>>, %arg8: memref<7x240x128xf32, #tpu.memory_space<vmem>>, %arg9: memref<1x128xf32, #tpu.memory_space<vmem>>, %arg10: memref<2x128xf32, #tpu.memory_space<vmem>>) attributes {dimension_semantics = [], scalar_prefetch = 0 : i64, scratch_operands = 0 : i64, tpu.core_type = #tpu.core_type<tc>} {
    %c0 = arith.constant 0 : index
    %c0_0 = arith.constant 0 : index
    %0 = vector.load %arg0[%c0, %c0_0] : memref<60x90xf32, #tpu.memory_space<vmem>>, vector<60x90xf32>
    %c0_1 = arith.constant 0 : index
    %c0_2 = arith.constant 0 : index
    %1 = vector.load %arg1[%c0_1, %c0_2] : memref<90x240xf32, #tpu.memory_space<vmem>>, vector<90x240xf32>
    %cst = arith.constant dense<0.000000e+00> : vector<60x240xf32>
    %2 = tpu.matmul %0, %1, %cst {dimension_numbers = #tpu.dot_dimension_numbers<[1], [0], [0], [1], [0, 0, 1, 1], [], []>} : vector<60x90xf32>, vector<90x240xf32>, vector<60x240xf32> -> vector<60x240xf32>
    %c0_3 = arith.constant 0 : index
    %c0_4 = arith.constant 0 : index
    %3 = vector.load %arg2[%c0_3, %c0_4] : memref<1x240xf32, #tpu.memory_space<vmem>>, vector<1x240xf32>
    %4 = vector.broadcast %3 : vector<1x240xf32> to vector<60x240xf32>
    %5 = arith.addf %2, %4 : vector<60x240xf32>
    %cst_5 = arith.constant 0.000000e+00 : f32
    %6 = vector.broadcast %cst_5 : f32 to vector<60x240xf32>
    %7 = arith.maximumf %5, %6 : vector<60x240xf32>
    %8 = vector.extract_strided_slice %7 {offsets = [0, 0], sizes = [60, 232], strides = [1, 1]} : vector<60x240xf32> to vector<60x232xf32>
    %9 = vector.extract_strided_slice %7 {offsets = [0, 8], sizes = [60, 232], strides = [1, 1]} : vector<60x240xf32> to vector<60x232xf32>
    %10 = arith.maximumf %8, %9 : vector<60x232xf32>
    %11 = vector.extract_strided_slice %10 {offsets = [0, 0], sizes = [59, 232], strides = [1, 1]} : vector<60x232xf32> to vector<59x232xf32>
    %12 = vector.extract_strided_slice %10 {offsets = [1, 0], sizes = [59, 232], strides = [1, 1]} : vector<60x232xf32> to vector<59x232xf32>
    %13 = arith.maximumf %11, %12 : vector<59x232xf32>
    %c0_6 = arith.constant 0 : index
    %c0_7 = arith.constant 0 : index
    %14 = vector.load %arg4[%c0_6, %c0_7] : memref<232x128xf32, #tpu.memory_space<vmem>>, vector<232x128xf32>
    %cst_8 = arith.constant dense<0.000000e+00> : vector<59x128xf32>
    %15 = tpu.matmul %13, %14, %cst_8 {dimension_numbers = #tpu.dot_dimension_numbers<[1], [0], [0], [1], [0, 0, 1, 1], [], []>} : vector<59x232xf32>, vector<232x128xf32>, vector<59x128xf32> -> vector<59x128xf32>
    %c0_9 = arith.constant 0 : index
    %c0_10 = arith.constant 0 : index
    %16 = vector.load %arg3[%c0_9, %c0_10] : memref<96x59xf32, #tpu.memory_space<vmem>>, vector<96x59xf32>
    %cst_11 = arith.constant dense<0.000000e+00> : vector<96x128xf32>
    %17 = tpu.matmul %16, %15, %cst_11 {dimension_numbers = #tpu.dot_dimension_numbers<[1], [0], [0], [1], [0, 0, 1, 1], [], []>} : vector<96x59xf32>, vector<59x128xf32>, vector<96x128xf32> -> vector<96x128xf32>
    %18 = vector.extract_strided_slice %17 {offsets = [0, 0], sizes = [32, 128], strides = [1, 1]} : vector<96x128xf32> to vector<32x128xf32>
    %c0_12 = arith.constant 0 : index
    %c0_13 = arith.constant 0 : index
    %c0_14 = arith.constant 0 : index
    %19 = vector.load %arg5[%c0_12, %c0_13, %c0_14] : memref<3x128x256xf32, #tpu.memory_space<vmem>>, vector<1x128x256xf32>
    %20 = vector.shape_cast %19 : vector<1x128x256xf32> to vector<128x256xf32>
    %cst_15 = arith.constant dense<0.000000e+00> : vector<32x256xf32>
    %21 = tpu.matmul %18, %20, %cst_15 {dimension_numbers = #tpu.dot_dimension_numbers<[1], [0], [0], [1], [0, 0, 1, 1], [], []>} : vector<32x128xf32>, vector<128x256xf32>, vector<32x256xf32> -> vector<32x256xf32>
    %22 = vector.extract_strided_slice %17 {offsets = [32, 0], sizes = [32, 128], strides = [1, 1]} : vector<96x128xf32> to vector<32x128xf32>
    %c1 = arith.constant 1 : index
    %c0_16 = arith.constant 0 : index
    %c0_17 = arith.constant 0 : index
    %23 = vector.load %arg5[%c1, %c0_16, %c0_17] : memref<3x128x256xf32, #tpu.memory_space<vmem>>, vector<1x128x256xf32>
    %24 = vector.shape_cast %23 : vector<1x128x256xf32> to vector<128x256xf32>
    %cst_18 = arith.constant dense<0.000000e+00> : vector<32x256xf32>
    %25 = tpu.matmul %22, %24, %cst_18 {dimension_numbers = #tpu.dot_dimension_numbers<[1], [0], [0], [1], [0, 0, 1, 1], [], []>} : vector<32x128xf32>, vector<128x256xf32>, vector<32x256xf32> -> vector<32x256xf32>
    %26 = arith.addf %21, %25 : vector<32x256xf32>
    %27 = vector.extract_strided_slice %17 {offsets = [64, 0], sizes = [32, 128], strides = [1, 1]} : vector<96x128xf32> to vector<32x128xf32>
    %c2 = arith.constant 2 : index
    %c0_19 = arith.constant 0 : index
    %c0_20 = arith.constant 0 : index
    %28 = vector.load %arg5[%c2, %c0_19, %c0_20] : memref<3x128x256xf32, #tpu.memory_space<vmem>>, vector<1x128x256xf32>
    %29 = vector.shape_cast %28 : vector<1x128x256xf32> to vector<128x256xf32>
    %cst_21 = arith.constant dense<0.000000e+00> : vector<32x256xf32>
    %30 = tpu.matmul %27, %29, %cst_21 {dimension_numbers = #tpu.dot_dimension_numbers<[1], [0], [0], [1], [0, 0, 1, 1], [], []>} : vector<32x128xf32>, vector<128x256xf32>, vector<32x256xf32> -> vector<32x256xf32>
    %31 = arith.addf %26, %30 : vector<32x256xf32>
    %c0_22 = arith.constant 0 : index
    %c0_23 = arith.constant 0 : index
    %32 = vector.load %arg6[%c0_22, %c0_23] : memref<1x256xf32, #tpu.memory_space<vmem>>, vector<1x256xf32>
    %33 = vector.broadcast %32 : vector<1x256xf32> to vector<32x256xf32>
    %34 = arith.addf %31, %33 : vector<32x256xf32>
    %cst_24 = arith.constant 0.000000e+00 : f32
    %35 = vector.broadcast %cst_24 : f32 to vector<32x256xf32>
    %36 = arith.maximumf %34, %35 : vector<32x256xf32>
    %37 = vector.extract_strided_slice %36 {offsets = [0, 0], sizes = [32, 240], strides = [1, 1]} : vector<32x256xf32> to vector<32x240xf32>
    %38 = vector.extract_strided_slice %36 {offsets = [0, 16], sizes = [32, 240], strides = [1, 1]} : vector<32x256xf32> to vector<32x240xf32>
    %39 = arith.maximumf %37, %38 : vector<32x240xf32>
    %40 = vector.extract_strided_slice %39 {offsets = [0, 0], sizes = [31, 240], strides = [1, 1]} : vector<32x240xf32> to vector<31x240xf32>
    %41 = vector.extract_strided_slice %39 {offsets = [1, 0], sizes = [31, 240], strides = [1, 1]} : vector<32x240xf32> to vector<31x240xf32>
    %42 = arith.maximumf %40, %41 : vector<31x240xf32>
    %cst_25 = arith.constant 0.000000e+00 : f32
    %43 = vector.broadcast %cst_25 : f32 to vector<2x128xf32>
    %c0_26 = arith.constant 0 : index
    %c0_27 = arith.constant 0 : index
    %44 = vector.load %arg9[%c0_26, %c0_27] : memref<1x128xf32, #tpu.memory_space<vmem>>, vector<1x128xf32>
    %45 = vector.broadcast %44 : vector<1x128xf32> to vector<2x128xf32>
    %46 = arith.addf %43, %45 : vector<2x128xf32>
    %c0_28 = arith.constant 0 : index
    %c0_29 = arith.constant 0 : index
    %47 = vector.load %arg7[%c0_28, %c0_29] : memref<14x31xf32, #tpu.memory_space<vmem>>, vector<2x31xf32>
    %cst_30 = arith.constant dense<0.000000e+00> : vector<2x240xf32>
    %48 = tpu.matmul %47, %42, %cst_30 {dimension_numbers = #tpu.dot_dimension_numbers<[1], [0], [0], [1], [0, 0, 1, 1], [], []>} : vector<2x31xf32>, vector<31x240xf32>, vector<2x240xf32> -> vector<2x240xf32>
    %c0_31 = arith.constant 0 : index
    %c0_32 = arith.constant 0 : index
    %c0_33 = arith.constant 0 : index
    %49 = vector.load %arg8[%c0_31, %c0_32, %c0_33] : memref<7x240x128xf32, #tpu.memory_space<vmem>>, vector<1x240x128xf32>
    %50 = vector.shape_cast %49 : vector<1x240x128xf32> to vector<240x128xf32>
    %cst_34 = arith.constant dense<0.000000e+00> : vector<2x128xf32>
    %51 = tpu.matmul %48, %50, %cst_34 {dimension_numbers = #tpu.dot_dimension_numbers<[1], [0], [0], [1], [0, 0, 1, 1], [], []>} : vector<2x240xf32>, vector<240x128xf32>, vector<2x128xf32> -> vector<2x128xf32>
    %52 = arith.addf %46, %51 : vector<2x128xf32>
    %c2_35 = arith.constant 2 : index
    %c0_36 = arith.constant 0 : index
    %53 = vector.load %arg7[%c2_35, %c0_36] : memref<14x31xf32, #tpu.memory_space<vmem>>, vector<2x31xf32>
    %cst_37 = arith.constant dense<0.000000e+00> : vector<2x240xf32>
    %54 = tpu.matmul %53, %42, %cst_37 {dimension_numbers = #tpu.dot_dimension_numbers<[1], [0], [0], [1], [0, 0, 1, 1], [], []>} : vector<2x31xf32>, vector<31x240xf32>, vector<2x240xf32> -> vector<2x240xf32>
    %c1_38 = arith.constant 1 : index
    %c0_39 = arith.constant 0 : index
    %c0_40 = arith.constant 0 : index
    %55 = vector.load %arg8[%c1_38, %c0_39, %c0_40] : memref<7x240x128xf32, #tpu.memory_space<vmem>>, vector<1x240x128xf32>
    %56 = vector.shape_cast %55 : vector<1x240x128xf32> to vector<240x128xf32>
    %cst_41 = arith.constant dense<0.000000e+00> : vector<2x128xf32>
    %57 = tpu.matmul %54, %56, %cst_41 {dimension_numbers = #tpu.dot_dimension_numbers<[1], [0], [0], [1], [0, 0, 1, 1], [], []>} : vector<2x240xf32>, vector<240x128xf32>, vector<2x128xf32> -> vector<2x128xf32>
    %58 = arith.addf %52, %57 : vector<2x128xf32>
    %c4 = arith.constant 4 : index
    %c0_42 = arith.constant 0 : index
    %59 = vector.load %arg7[%c4, %c0_42] : memref<14x31xf32, #tpu.memory_space<vmem>>, vector<2x31xf32>
    %cst_43 = arith.constant dense<0.000000e+00> : vector<2x240xf32>
    %60 = tpu.matmul %59, %42, %cst_43 {dimension_numbers = #tpu.dot_dimension_numbers<[1], [0], [0], [1], [0, 0, 1, 1], [], []>} : vector<2x31xf32>, vector<31x240xf32>, vector<2x240xf32> -> vector<2x240xf32>
    %c2_44 = arith.constant 2 : index
    %c0_45 = arith.constant 0 : index
    %c0_46 = arith.constant 0 : index
    %61 = vector.load %arg8[%c2_44, %c0_45, %c0_46] : memref<7x240x128xf32, #tpu.memory_space<vmem>>, vector<1x240x128xf32>
    %62 = vector.shape_cast %61 : vector<1x240x128xf32> to vector<240x128xf32>
    %cst_47 = arith.constant dense<0.000000e+00> : vector<2x128xf32>
    %63 = tpu.matmul %60, %62, %cst_47 {dimension_numbers = #tpu.dot_dimension_numbers<[1], [0], [0], [1], [0, 0, 1, 1], [], []>} : vector<2x240xf32>, vector<240x128xf32>, vector<2x128xf32> -> vector<2x128xf32>
    %64 = arith.addf %58, %63 : vector<2x128xf32>
    %c6 = arith.constant 6 : index
    %c0_48 = arith.constant 0 : index
    %65 = vector.load %arg7[%c6, %c0_48] : memref<14x31xf32, #tpu.memory_space<vmem>>, vector<2x31xf32>
    %cst_49 = arith.constant dense<0.000000e+00> : vector<2x240xf32>
    %66 = tpu.matmul %65, %42, %cst_49 {dimension_numbers = #tpu.dot_dimension_numbers<[1], [0], [0], [1], [0, 0, 1, 1], [], []>} : vector<2x31xf32>, vector<31x240xf32>, vector<2x240xf32> -> vector<2x240xf32>
    %c3 = arith.constant 3 : index
    %c0_50 = arith.constant 0 : index
    %c0_51 = arith.constant 0 : index
    %67 = vector.load %arg8[%c3, %c0_50, %c0_51] : memref<7x240x128xf32, #tpu.memory_space<vmem>>, vector<1x240x128xf32>
    %68 = vector.shape_cast %67 : vector<1x240x128xf32> to vector<240x128xf32>
    %cst_52 = arith.constant dense<0.000000e+00> : vector<2x128xf32>
    %69 = tpu.matmul %66, %68, %cst_52 {dimension_numbers = #tpu.dot_dimension_numbers<[1], [0], [0], [1], [0, 0, 1, 1], [], []>} : vector<2x240xf32>, vector<240x128xf32>, vector<2x128xf32> -> vector<2x128xf32>
    %70 = arith.addf %64, %69 : vector<2x128xf32>
    %c8 = arith.constant 8 : index
    %c0_53 = arith.constant 0 : index
    %71 = vector.load %arg7[%c8, %c0_53] : memref<14x31xf32, #tpu.memory_space<vmem>>, vector<2x31xf32>
    %cst_54 = arith.constant dense<0.000000e+00> : vector<2x240xf32>
    %72 = tpu.matmul %71, %42, %cst_54 {dimension_numbers = #tpu.dot_dimension_numbers<[1], [0], [0], [1], [0, 0, 1, 1], [], []>} : vector<2x31xf32>, vector<31x240xf32>, vector<2x240xf32> -> vector<2x240xf32>
    %c4_55 = arith.constant 4 : index
    %c0_56 = arith.constant 0 : index
    %c0_57 = arith.constant 0 : index
    %73 = vector.load %arg8[%c4_55, %c0_56, %c0_57] : memref<7x240x128xf32, #tpu.memory_space<vmem>>, vector<1x240x128xf32>
    %74 = vector.shape_cast %73 : vector<1x240x128xf32> to vector<240x128xf32>
    %cst_58 = arith.constant dense<0.000000e+00> : vector<2x128xf32>
    %75 = tpu.matmul %72, %74, %cst_58 {dimension_numbers = #tpu.dot_dimension_numbers<[1], [0], [0], [1], [0, 0, 1, 1], [], []>} : vector<2x240xf32>, vector<240x128xf32>, vector<2x128xf32> -> vector<2x128xf32>
    %76 = arith.addf %70, %75 : vector<2x128xf32>
    %c10 = arith.constant 10 : index
    %c0_59 = arith.constant 0 : index
    %77 = vector.load %arg7[%c10, %c0_59] : memref<14x31xf32, #tpu.memory_space<vmem>>, vector<2x31xf32>
    %cst_60 = arith.constant dense<0.000000e+00> : vector<2x240xf32>
    %78 = tpu.matmul %77, %42, %cst_60 {dimension_numbers = #tpu.dot_dimension_numbers<[1], [0], [0], [1], [0, 0, 1, 1], [], []>} : vector<2x31xf32>, vector<31x240xf32>, vector<2x240xf32> -> vector<2x240xf32>
    %c5 = arith.constant 5 : index
    %c0_61 = arith.constant 0 : index
    %c0_62 = arith.constant 0 : index
    %79 = vector.load %arg8[%c5, %c0_61, %c0_62] : memref<7x240x128xf32, #tpu.memory_space<vmem>>, vector<1x240x128xf32>
    %80 = vector.shape_cast %79 : vector<1x240x128xf32> to vector<240x128xf32>
    %cst_63 = arith.constant dense<0.000000e+00> : vector<2x128xf32>
    %81 = tpu.matmul %78, %80, %cst_63 {dimension_numbers = #tpu.dot_dimension_numbers<[1], [0], [0], [1], [0, 0, 1, 1], [], []>} : vector<2x240xf32>, vector<240x128xf32>, vector<2x128xf32> -> vector<2x128xf32>
    %82 = arith.addf %76, %81 : vector<2x128xf32>
    %c12 = arith.constant 12 : index
    %c0_64 = arith.constant 0 : index
    %83 = vector.load %arg7[%c12, %c0_64] : memref<14x31xf32, #tpu.memory_space<vmem>>, vector<2x31xf32>
    %cst_65 = arith.constant dense<0.000000e+00> : vector<2x240xf32>
    %84 = tpu.matmul %83, %42, %cst_65 {dimension_numbers = #tpu.dot_dimension_numbers<[1], [0], [0], [1], [0, 0, 1, 1], [], []>} : vector<2x31xf32>, vector<31x240xf32>, vector<2x240xf32> -> vector<2x240xf32>
    %c6_66 = arith.constant 6 : index
    %c0_67 = arith.constant 0 : index
    %c0_68 = arith.constant 0 : index
    %85 = vector.load %arg8[%c6_66, %c0_67, %c0_68] : memref<7x240x128xf32, #tpu.memory_space<vmem>>, vector<1x240x128xf32>
    %86 = vector.shape_cast %85 : vector<1x240x128xf32> to vector<240x128xf32>
    %cst_69 = arith.constant dense<0.000000e+00> : vector<2x128xf32>
    %87 = tpu.matmul %84, %86, %cst_69 {dimension_numbers = #tpu.dot_dimension_numbers<[1], [0], [0], [1], [0, 0, 1, 1], [], []>} : vector<2x240xf32>, vector<240x128xf32>, vector<2x128xf32> -> vector<2x128xf32>
    %88 = arith.addf %82, %87 : vector<2x128xf32>
    %c0_70 = arith.constant 0 : index
    %c0_71 = arith.constant 0 : index
    %89 = vector.load %arg10[%c0_70, %c0_71] : memref<2x128xf32, #tpu.memory_space<vmem>>, vector<2x128xf32>
    tpu.vector_store %arg10[%c0_70, %c0_71], %88 {strides = array<i32>} : memref<2x128xf32, #tpu.memory_space<vmem>>, vector<2x128xf32>,
    return
  }
}

</mosaic_0001>

<bundles_post_ra>
// kernel: tile.29
= control target key start
LH: loop header
LB: loop body
LE: loop exit
PB: predicated region body
PF: predicated region fallthrough
CT: control target
= control target key end

     0   :  { %s19_s8 = smov 3  ;;  %s154_s9 = smov 120   ;;  %vm4_vm0 = vcmask 64512   ;;  %vm10_vm1 = vcmask 1048512   ;;  %vm16_vm2 = vcmask 982912   ;;  %vm23_vm3 = vcmask 917312   ;;  %s233_s0 = inlined_call_operand.vmem [shape: f32[30,8], index: 0, kind: input, shape index: {}]   ;;  %s234_s1 = inlined_call_operand.vmem [shape: f32[1,240], index: 1, kind: output, shape index: {}]  }
   0x1   :  { %v123_v0 = vld [vmem:[%s233_s0 + $0xf] sm:$0x1]   ;;  %v125_v1 = vld [vmem:[%s233_s0 + $0xd] ss:$16 sm:%s19_s8]   ;;  %s155_s12 = smov 104   ;;  %s26_s15 = smov 3 }
   0x2   :  { %8 = vrot.lane.b32.xlu0 %v123_v0, %s154_s9  ;;  %21 = vrot.lane.b32.xlu1 %v125_v1, %s155_s12  ;;  %v124_v2 = vld [vmem:[%s233_s0 + $0xe] sm:$0x1]   ;;  %s33_s18 = smov 3  ;;  %s40_s19 = smov 3  ;;  %vm30_vm4 = vcmask 851712   ;;  %vm37_vm5 = vcmask 786112  }
   0x3   :  { %v126_v3 = vld [vmem:[%s233_s0 + $0xc] ss:$16 sm:%s26_s15]   ;;  %s156_s20 = smov 112   ;;  %s157_s21 = smov 96   ;;  %v127_v4 = vld [vmem:[%s233_s0 + $0xb] ss:$16 sm:%s33_s18]  }
   0x4   :  { %v128_v5 = vld [vmem:[%s233_s0 + $0xa] ss:$16 sm:%s40_s19]   ;;  %s47_s26 = smov 3  ;;  %s54_s27 = smov 3  ;;  %vm44_vm6 = vcmask 720512   ;;  %vm51_vm7 = vcmask 654912  }
   0x5   :  { %s158_s28 = smov 88   ;;  %s159_s29 = smov 80   ;;  %v129_v6 = vld [vmem:[%s233_s0 + $0x9] ss:$16 sm:%s47_s26]   ;;  %v130_v7 = vld [vmem:[%s233_s0 + $0x8] ss:$16 sm:%s54_s27]  }
   0x6   :  { %14 = vrot.lane.b32.xlu0 %v124_v2, %s156_s20  ;;  %28 = vrot.lane.b32.xlu1 %v126_v3, %s157_s21  ;;  %s61_s5 = smov 3  ;;  %s68_s6 = smov 3  ;;  %vm58_vm8 = vcmask 589312   ;;  %vm65_vm9 = vcmask 523712   ;;  %vm72_vm10 = vcmask 458112   ;;  %vm79_vm11 = vcmask 392512  }
   0x7   :  { %s160_s7 = smov 72   ;;  %s161_s8 = smov 64   ;;  %v131_v8 = vld [vmem:[%s233_s0 + $0x7] ss:$16 sm:%s61_s5]   ;;  %v132_v9 = vld [vmem:[%s233_s0 + $0x6] ss:$16 sm:%s68_s6]  }
   0x8   :  { %s2_s11 = smov 3  ;;  %s75_s14 = smov 3  ;;  %vm86_vm12 = vcmask 326912   ;;  %vm93_vm13 = vcmask 261312   ;;  %vm100_vm14 = vcmask 195712   ;;  %vm107_vm15 = vcmask 130112  }
   0x9   :  { %v3_v10 = vld [vmem:[%s233_s0] ss:$16 sm:%s2_s11]   ;;  %s82_s17 = smov 3  ;;  %s162_s18 = smov 56   ;;  %v133_v11 = vld [vmem:[%s233_s0 + $0x5] ss:$16 sm:%s75_s14]  }
   0xa   :  { %35 = vrot.lane.b32.xlu0 %v127_v4, %s158_s28  ;;  %42 = vrot.lane.b32.xlu1 %v128_v5, %s159_s29  ;;  %5 = vst.msk [vmem:[#allocation0] ss:$8 sm:$0x3] %vm4_vm0, %v3_v10   ;;  %s163_s19 = smov 48   ;;  %v134_v12 = vld [vmem:[%s233_s0 + $0x4] ss:$16 sm:%s82_s17]  }
   0xb   :  { %s89_s24 = smov 3  ;;  %s96_s25 = smov 3 }
   0xc   :  { %s164_s26 = smov 40   ;;  %s165_s27 = smov 32   ;;  %v135_v13 = vld [vmem:[%s233_s0 + $0x3] ss:$16 sm:%s89_s24]   ;;  %v136_v14 = vld [vmem:[%s233_s0 + $0x2] ss:$16 sm:%s96_s25]  }
   0xd   :  { %s103_s3 = smov 3  ;;  %s166_s4 = smov 24  }
   0xe   :  { %49 = vrot.lane.b32.xlu0 %v129_v6, %s160_s7  ;;  %56 = vrot.lane.b32.xlu1 %v130_v7, %s161_s8  ;;  %s167_s5 = smov 16   ;;  %v137_v15 = vld [vmem:[%s233_s0 + $0x1] ss:$16 sm:%s103_s3]   ;;  %s168_s0 = smov 8  }
  0x12   :  { %63 = vrot.lane.b32.xlu0 %v131_v8, %s162_s18  ;;  %70 = vrot.lane.b32.xlu1 %v132_v9, %s163_s19 }
  0x16   :  { %77 = vrot.lane.b32.xlu0 %v133_v11, %s164_s26  ;;  %84 = vrot.lane.b32.xlu1 %v134_v12, %s165_s27 }
  0x1a   :  { %91 = vrot.lane.b32.xlu0 %v135_v13, %s166_s4  ;;  %98 = vrot.lane.b32.xlu1 %v136_v14, %s167_s5 }
  0x1e   :  { %105 = vrot.lane.b32.xlu0 %v137_v15, %s168_s0 }
  0x74   :  { %v9_v16 = vpop.permute.xlu0 %8   ;;  %v22_v17 = vpop.permute.xlu1 %21  }
  0x75   :  { %11 = vst.msk [vmem:[#allocation0] sm:$0x1] %vm10_vm1, %v9_v16  }
  0x78   :  { %v15_v18 = vpop.permute.xlu0 %14   ;;  %v29_v19 = vpop.permute.xlu1 %28  }
  0x79   :  { %17 = vst.msk [vmem:[#allocation0] sm:$0x1] %vm16_vm2, %v15_v18  }
  0x7a   :  { %24 = vst.msk [vmem:[#allocation0] ss:$8 sm:$0x3] %vm23_vm3, %v22_v17  }
  0x7b   :  { %31 = vst.msk [vmem:[#allocation0] ss:$8 sm:$0x3] %vm30_vm4, %v29_v19  }
  0x7c   :  { %v36_v20 = vpop.permute.xlu0 %35   ;;  %v43_v21 = vpop.permute.xlu1 %42  }
  0x7d   :  { %38 = vst.msk [vmem:[#allocation0] ss:$8 sm:$0x3] %vm37_vm5, %v36_v20  }
  0x7e   :  { %45 = vst.msk [vmem:[#allocation0] ss:$8 sm:$0x3] %vm44_vm6, %v43_v21  }
  0x80   :  { %v50_v22 = vpop.permute.xlu0 %49   ;;  %v57_v23 = vpop.permute.xlu1 %56  }
  0x81   :  { %52 = vst.msk [vmem:[#allocation0] ss:$8 sm:$0x3] %vm51_vm7, %v50_v22  }
  0x82   :  { %59 = vst.msk [vmem:[#allocation0] ss:$8 sm:$0x3] %vm58_vm8, %v57_v23  }
  0x84   :  { %v64_v24 = vpop.permute.xlu0 %63   ;;  %v71_v25 = vpop.permute.xlu1 %70  }
  0x85   :  { %66 = vst.msk [vmem:[#allocation0] ss:$8 sm:$0x3] %vm65_vm9, %v64_v24  }
  0x86   :  { %73 = vst.msk [vmem:[#allocation0] ss:$8 sm:$0x3] %vm72_vm10, %v71_v25  }
  0x88   :  { %v78_v26 = vpop.permute.xlu0 %77   ;;  %v85_v27 = vpop.permute.xlu1 %84  }
  0x89   :  { %80 = vst.msk [vmem:[#allocation0] ss:$8 sm:$0x3] %vm79_vm11, %v78_v26  }
  0x8a   :  { %87 = vst.msk [vmem:[#allocation0] ss:$8 sm:$0x3] %vm86_vm12, %v85_v27  }
  0x8c   :  { %v92_v28 = vpop.permute.xlu0 %91   ;;  %v99_v29 = vpop.permute.xlu1 %98  }
  0x8d   :  { %94 = vst.msk [vmem:[#allocation0] ss:$8 sm:$0x3] %vm93_vm13, %v92_v28  }
  0x8e   :  { %101 = vst.msk [vmem:[#allocation0] ss:$8 sm:$0x3] %vm100_vm14, %v99_v29  }
  0x90   :  { %v106_v30 = vpop.permute.xlu0 %105  }
  0x91   :  { %108 = vst.msk [vmem:[#allocation0] ss:$8 sm:$0x3] %vm107_vm15, %v106_v30  }
  0x98   :  { %v113_v31 = vld [vmem:[#allocation0] sm:$0x1]  ;;  %v118_v32 = vld [vmem:[#allocation0 + $0x8] sm:$0x1] }
  0x99   :  { %116 = vst [vmem:[%s234_s1] sm:$0x1] %v113_v31  ;;  %138 = vst [vmem:[%s234_s1 + $0x1] sm:$0x1] %v118_v32 }

// kernel: tile.33
= control target key start
LH: loop header
LB: loop body
LE: loop exit
PB: predicated region body
PF: predicated region fallthrough
CT: control target
= control target key end

     0   :  { %s28_s0 = inlined_call_operand.vmem [shape: f32[16], index: 0, kind: input, shape index: {}]   ;;  %s29_s1 = inlined_call_operand.vmem [shape: f32[16,16], index: 1, kind: output, shape index: {}]  }
   0x1   :  { %v4_v0 = vld [vmem:[%s28_s0] ss:$0 sm:$0xff] }
   0x2   :  { %5 = vst [vmem:[%s29_s1] sm:$0xff] %v4_v0  ;;  %8 = vst [vmem:[%s29_s1 + $0x8] sm:$0xff] %v4_v0 }

// kernel: tile.34
= control target key start
LH: loop header
LB: loop body
LE: loop exit
PB: predicated region body
PF: predicated region fallthrough
CT: control target
= control target key end

     0   :  { %s7_s6 = smov 3  ;;  %s21_s9 = smov 3  ;;  %vm4_vm0 = vcmask 130048   ;;  %vm11_vm1 = vcmask 1048448   ;;  %vm18_vm2 = vcmask 917248   ;;  %vm25_vm3 = vcmask 786048   ;;  %s131_s0 = inlined_call_operand.vmem [shape: f32[16,16], index: 0, kind: input, shape index: {}]   ;;  %s132_s1 = inlined_call_operand.vmem [shape: f32[1,256], index: 1, kind: output, shape index: {}]  }
   0x1   :  { %v69_v0 = vld [vmem:[%s131_s0 + $0x7] ss:$8 sm:%s7_s6]   ;;  %s84_s10 = smov 112   ;;  %v71_v1 = vld [vmem:[%s131_s0 + $0x5] ss:$8 sm:%s21_s9]   ;;  %s14_s13 = smov 3 }
   0x2   :  { %9 = vrot.lane.b32.xlu0 %v69_v0, %s84_s10  ;;  %s85_s14 = smov 80   ;;  %v70_v2 = vld [vmem:[%s131_s0 + $0x6] ss:$8 sm:%s14_s13]   ;;  %s28_s17 = smov 3  ;;  %vm32_vm4 = vcmask 654848   ;;  %vm39_vm5 = vcmask 523648  }
   0x3   :  { %23 = vrot.lane.b32.xlu1 %v71_v1, %s85_s14  ;;  %v72_v3 = vld [vmem:[%s131_s0 + $0x4] ss:$8 sm:%s28_s17]   ;;  %s35_s20 = smov 3  ;;  %s42_s21 = smov 3  ;;  %vm46_vm6 = vcmask 392448   ;;  %vm53_vm7 = vcmask 261248  }
   0x4   :  { %s86_s22 = smov 96   ;;  %s87_s23 = smov 64   ;;  %v73_v4 = vld [vmem:[%s131_s0 + $0x3] ss:$8 sm:%s35_s20]   ;;  %v74_v5 = vld [vmem:[%s131_s0 + $0x2] ss:$8 sm:%s42_s21]  }
   0x5   :  { %s2_s26 = smov 3  ;;  %s49_s29 = smov 3 }
   0x6   :  { %16 = vrot.lane.b32.xlu0 %v70_v2, %s86_s22  ;;  %v3_v6 = vld [vmem:[%s131_s0] ss:$8 sm:%s2_s26]   ;;  %s88_s3 = smov 48   ;;  %s89_s4 = smov 32  }
   0x7   :  { %30 = vrot.lane.b32.xlu1 %v72_v3, %s87_s23  ;;  %5 = vst.msk [vmem:[#allocation0] ss:$8 sm:$0x3] %vm4_vm0, %v3_v6   ;;  %v75_v7 = vld [vmem:[%s131_s0 + $0x1] ss:$8 sm:%s49_s29]   ;;  %s90_s0 = smov 16  }
   0xa   :  { %37 = vrot.lane.b32.xlu0 %v73_v4, %s88_s3 }
   0xb   :  { %44 = vrot.lane.b32.xlu1 %v74_v5, %s89_s4 }
   0xe   :  { %51 = vrot.lane.b32.xlu0 %v75_v7, %s90_s0 }
  0x74   :  { %v10_v8 = vpop.permute.xlu0 %9  }
  0x75   :  { %12 = vst.msk [vmem:[#allocation0] ss:$8 sm:$0x3] %vm11_vm1, %v10_v8   ;;  %v24_v9 = vpop.permute.xlu1 %23  }
  0x78   :  { %v17_v10 = vpop.permute.xlu0 %16  }
  0x79   :  { %19 = vst.msk [vmem:[#allocation0] ss:$8 sm:$0x3] %vm18_vm2, %v17_v10   ;;  %v31_v11 = vpop.permute.xlu1 %30  }
  0x7a   :  { %26 = vst.msk [vmem:[#allocation0] ss:$8 sm:$0x3] %vm25_vm3, %v24_v9  }
  0x7b   :  { %33 = vst.msk [vmem:[#allocation0] ss:$8 sm:$0x3] %vm32_vm4, %v31_v11  }
  0x7c   :  { %v38_v12 = vpop.permute.xlu0 %37  }
  0x7d   :  { %40 = vst.msk [vmem:[#allocation0] ss:$8 sm:$0x3] %vm39_vm5, %v38_v12   ;;  %v45_v13 = vpop.permute.xlu1 %44  }
  0x7e   :  { %47 = vst.msk [vmem:[#allocation0] ss:$8 sm:$0x3] %vm46_vm6, %v45_v13  }
  0x80   :  { %v52_v14 = vpop.permute.xlu0 %51  }
  0x81   :  { %54 = vst.msk [vmem:[#allocation0] ss:$8 sm:$0x3] %vm53_vm7, %v52_v14  }
  0x88   :  { %v59_v15 = vld [vmem:[#allocation0] sm:$0x1]  ;;  %v64_v16 = vld [vmem:[#allocation0 + $0x8] sm:$0x1] }
  0x89   :  { %62 = vst [vmem:[%s132_s1] sm:$0x1] %v59_v15  ;;  %76 = vst [vmem:[%s132_s1 + $0x1] sm:$0x1] %v64_v16 }

// kernel: cnn_forward.1
= control target key start
LH: loop header
LB: loop body
LE: loop exit
PB: predicated region body
PF: predicated region fallthrough
CT: control target
= control target key end

     0   :  { %vm105_vm0 = vcmask 1041408   ;;  %v2908_v5 = vmov 0.0   ;;  %s4773_s0 = inlined_call_operand.vmem [shape: f32[60,90], index: 0, kind: input, shape index: {}]   ;;  %s4774_s1 = inlined_call_operand.vmem [shape: f32[90,240], index: 1, kind: input, shape index: {}]   ;;  %s4775_s2 = inlined_call_operand.vmem [shape: f32[1,240], index: 2, kind: input, shape index: {}]   ;;  %s4776_s3 = inlined_call_operand.vmem [shape: f32[96,59], index: 3, kind: input, shape index: {}]   ;;  %s4777_s4 = inlined_call_operand.vmem [shape: f32[232,128], index: 4, kind: input, shape index: {}]   ;;  %s4778_s5 = inlined_call_operand.vmem [shape: f32[3,128,256], index: 5, kind: input, shape index: {}]   ;;  %s4779_s6 = inlined_call_operand.vmem [shape: f32[1,256], index: 6, kind: input, shape index: {}]   ;;  %s4780_s7 = inlined_call_operand.vmem [shape: f32[14,31], index: 7, kind: input, shape index: {}]   ;;  %s4781_s8 = inlined_call_operand.vmem [shape: f32[7,240,128], index: 8, kind: input, shape index: {}]   ;;  %s4782_s9 = inlined_call_operand.vmem [shape: f32[1,128], index: 9, kind: input, shape index: {}]   ;;  %s4783_s10 = inlined_call_operand.hbm [shape: f32[2,128], index: 10, kind: output, shape index: {}]  }
   0x1   :  { %v67_v0 = vld [vmem:[%s4774_s1 + $0xb8] sm:$0x3]  ;;  %v66_v1 = vld [vmem:[%s4774_s1 + $0xb0] sm:$0x3]  ;;  %v65_v2 = vld [vmem:[%s4774_s1 + $0xa8] sm:$0xff]  ;;  %176 = vmatprep.mubr.f32.mxu0 %v2908_v5  ;;  %463 = vmatprep.subr.mxu1 %v2908_v5 }
   0x2   :  { %2519 = vmatprep.subr.msk.mxu0 %vm105_vm0, %v67_v0  ;;  %v64_v3 = vld [vmem:[%s4774_s1 + $0xa0] sm:$0xff]  ;;  %v63_v4 = vld [vmem:[%s4774_s1 + $0x98] sm:$0xff]  ;;  %v62_v6 = vld [vmem:[%s4774_s1 + $0x90] sm:$0xff] }
   0x3   :  { %2520 = vmatpush1.msk.msra.mxu0 %vm105_vm0, %v66_v1  ;;  %v61_v7 = vld [vmem:[%s4774_s1 + $0x88] sm:$0xff]  ;;  %v60_v8 = vld [vmem:[%s4774_s1 + $0x80] sm:$0xff]  ;;  %v59_v9 = vld [vmem:[%s4774_s1 + $0x78] sm:$0xff] }
   0x4   :  { %122 = vmatprep.subr.mxu0 %v65_v2  ;;  %v58_v10 = vld [vmem:[%s4774_s1 + $0x70] sm:$0xff]  ;;  %v57_v11 = vld [vmem:[%s4774_s1 + $0x68] sm:$0xff]  ;;  %v56_v12 = vld [vmem:[%s4774_s1 + $0x60] sm:$0xff] }
   0x5   :  { %123 = vmatpush1.msra.mxu0 %v64_v3  ;;  %v55_v13 = vld [vmem:[%s4774_s1 + $0x58] sm:$0xff]  ;;  %v54_v14 = vld [vmem:[%s4774_s1 + $0x50] sm:$0xff] }
   0x6   :  { %124 = vmatprep.subr.mxu0 %v63_v4 }
   0x7   :  { %125 = vmatpush1.msra.mxu0 %v62_v6 }
   0x8   :  { %126 = vmatprep.subr.mxu0 %v61_v7 }
   0x9   :  { %127 = vmatpush1.msra.mxu0 %v60_v8 }
   0xa   :  { %128 = vmatprep.subr.mxu0 %v59_v9 }
   0xb   :  { %129 = vmatpush1.msra.mxu0 %v58_v10 }
   0xc   :  { %130 = vmatprep.subr.mxu0 %v57_v11 }
   0xd   :  { %15 = vsyncpa [#allocation3], 0  ;;  %131 = vmatpush1.msra.mxu0 %v56_v12  ;;  %v53_v15 = vld [vmem:[%s4774_s1 + $0x48] sm:$0xff]  ;;  %v52_v16 = vld [vmem:[%s4774_s1 + $0x40] sm:$0xff]  ;;  %vm80_vm1 = vcmask 736256   ;;  %v70_v55 = vlaneseq  ;;  %s2909_s29 = smov 120  }
   0xe   :  { %132 = vmatprep.subr.mxu0 %v55_v13  ;;  %v51_v17 = vld [vmem:[%s4774_s1 + $0x38] sm:$0xff]  ;;  %v50_v18 = vld [vmem:[%s4774_s1 + $0x30] sm:$0xff]  ;;  %v49_v19 = vld [vmem:[%s4774_s1 + $0x28] sm:$0xff]  ;;  %vm289_vm2 = vcmask 982016   ;;  %vm346_vm3 = vcmask 1046528   ;;  %vm438_vm4 = vcmask 850944  }
   0xf   :  { %133 = vmatpush1.msra.mxu0 %v54_v14  ;;  %v48_v20 = vld [vmem:[%s4774_s1 + $0x20] sm:$0xff]  ;;  %v47_v21 = vld [vmem:[%s4774_s1 + $0x18] sm:$0xff]  ;;  %v46_v22 = vld [vmem:[%s4774_s1 + $0x10] sm:$0xff]  ;;  %v3168_v56 = vshrl.u32 %v70_v55, 7  ;;  %vm580_vm5 = vcmask 482304   ;;  %vm617_vm6 = vcmask 1042432  }
  0x10   :  { %134 = vmatprep.subr.mxu0 %v53_v15  ;;  %v45_v23 = vld [vmem:[%s4774_s1 + $0x8] sm:$0xff]  ;;  %v44_v24 = vld [vmem:[%s4774_s1] sm:$0xff]  ;;  %v38_v27 = vld [vmem:[%s4773_s0 + $0x10] sm:$0xff]  ;;  %vm1171_vm7 = vcmask 916480   ;;  %vm1239_vm8 = vcmask 252928   ;;  %s2911_s1 = smov [#allocation2]  }
  0x11   :  { %135 = vmatpush1.msra.mxu0 %v52_v16  ;;  %v36_v25 = vld [vmem:[%s4773_s0] sm:$0xff]  ;;  %v37_v26 = vld [vmem:[%s4773_s0 + $0x8] sm:$0xff]  ;;  %v39_v28 = vld [vmem:[%s4773_s0 + $0x18] sm:$0xff]  ;;  %v72_v58 = vsub.s32 0, %v3168_v56  ;;  %v76_v59 = vsub.s32 1, %v3168_v56  ;;  %s2511_s25 = sshll.u32 %s2911_s1, 4  ;;  %s2512_s25 = int_to_ptr.vmem [resolvable:$true] %s2511_s25 }
  0x12   :  { %136 = vmatprep.subr.mxu0 %v51_v17  ;;  %v40_v29 = vld [vmem:[%s4773_s0 + $0x20] sm:$0xff]  ;;  %v41_v30 = vld [vmem:[%s4773_s0 + $0x28] sm:$0xff]  ;;  %v42_v31 = vld [vmem:[%s4773_s0 + $0x30] sm:$0xff]  ;;  %p2891_p1 = scmp.lt.s32.totalorder %s2512_s25, %s2512_s25 }
  0x13   :  { %137 = vmatpush1.msra.mxu0 %v50_v18  ;;  %v43_v32 = vld [vmem:[%s4773_s0 + $0x38] sm:$0xf]  ;;  %v423_v34 = vld [vmem:[%s4777_s4 + $0x70] sm:$0xff]  ;;  %v422_v35 = vld [vmem:[%s4777_s4 + $0x68] sm:$0xff] }
  0x14   :  { %138 = vmatprep.subr.mxu0 %v49_v19  ;;  %v424_v33 = vld [vmem:[%s4777_s4 + $0x78] sm:$0xff]  ;;  %v421_v36 = vld [vmem:[%s4777_s4 + $0x60] sm:$0xff]  ;;  %v419_v38 = vld [vmem:[%s4777_s4 + $0x50] sm:$0xff] }
  0x15   :  { %139 = vmatpush1.msra.mxu0 %v48_v20  ;;  %464 = vmatpush1.msra.mxu1 %v424_v33  ;;  %v420_v37 = vld [vmem:[%s4777_s4 + $0x58] sm:$0xff]  ;;  %v418_v39 = vld [vmem:[%s4777_s4 + $0x48] sm:$0xff]  ;;  %v417_v40 = vld [vmem:[%s4777_s4 + $0x40] sm:$0xff] }
  0x16   :  { %140 = vmatprep.subr.mxu0 %v47_v21  ;;  %465 = vmatprep.subr.mxu1 %v2908_v5  ;;  %v416_v41 = vld [vmem:[%s4777_s4 + $0x38] sm:$0xff]  ;;  %v415_v42 = vld [vmem:[%s4777_s4 + $0x30] sm:$0xff]  ;;  %v414_v43 = vld [vmem:[%s4777_s4 + $0x28] sm:$0xff] }
  0x17   :  { %141 = vmatpush1.msra.mxu0 %v46_v22  ;;  %466 = vmatpush1.msra.mxu1 %v423_v34  ;;  %v413_v44 = vld [vmem:[%s4777_s4 + $0x20] sm:$0xff]  ;;  %v412_v45 = vld [vmem:[%s4777_s4 + $0x18] sm:$0xff]  ;;  %v411_v46 = vld [vmem:[%s4777_s4 + $0x10] sm:$0xff] }
  0x18   :  { %142 = vmatprep.subr.mxu0 %v45_v23  ;;  %467 = vmatprep.subr.mxu1 %v2908_v5  ;;  %v410_v47 = vld [vmem:[%s4777_s4 + $0x8] sm:$0xff]  ;;  %v409_v48 = vld [vmem:[%s4777_s4] sm:$0xff]  ;;  %v436_v50 = vld [vmem:[%s4777_s4 + $0xd8] sm:$0xff] }
  0x19   :  { %143 = vmatpush1.msra.mxu0 %v44_v24  ;;  %468 = vmatpush1.msra.mxu1 %v422_v35  ;;  %v437_v49 = vld [vmem:[%s4777_s4 + $0xe0] sm:$0xff]  ;;  %v435_v51 = vld [vmem:[%s4777_s4 + $0xd0] sm:$0xff]  ;;  %v434_v52 = vld [vmem:[%s4777_s4 + $0xc8] sm:$0xff] }
  0x1a   :  { %2521 = vmatmul.mubr.msk.f32.vlgmr.msra.gmra.mxu0 %vm80_vm1, %v36_v25  ;;  %469 = vmatprep.subr.mxu1 %v2908_v5  ;;  %v433_v53 = vld [vmem:[%s4777_s4 + $0xc0] sm:$0xff]  ;;  %v432_v54 = vld [vmem:[%s4777_s4 + $0xb8] sm:$0xff]  ;;  %v431_v57 = vld [vmem:[%s4777_s4 + $0xb0] sm:$0xff] }
  0x1b   :  { %182 = vmatprep.mubr.f32.mxu0 %v2908_v5  ;;  %470 = vmatpush1.msra.mxu1 %v421_v36  ;;  %v68_v60 = vld [vmem:[%s4775_s2] sm:$0x3]  ;;  %v430_v61 = vld [vmem:[%s4777_s4 + $0xa8] sm:$0xff]  ;;  %v428_v2 = vld [vmem:[%s4777_s4 + $0x98] sm:$0xff] }
  0x1c   :  { %471 = vmatprep.subr.mxu1 %v2908_v5  ;;  %v429_v62 = vld [vmem:[%s4777_s4 + $0xa0] sm:$0xff]  ;;  %v3188_v63 = vrot.slane %v68_v60, %v72_v58  ;;  %v3192_v0 = vrot.slane %v68_v60, %v76_v59  ;;  %v427_v4 = vld [vmem:[%s4777_s4 + $0x90] sm:$0xff]  ;;  %v426_v9 = vld [vmem:[%s4777_s4 + $0x88] sm:$0xff] }
  0x1d   :  { %472 = vmatpush1.msra.mxu1 %v420_v37  ;;  %v425_v13 = vld [vmem:[%s4777_s4 + $0x80] sm:$0xff] }
  0x1e   :  { %2522 = vmatmul.mubr.msk.f32.gmra.mxu0 %vm80_vm1, %v37_v26  ;;  %473 = vmatprep.subr.mxu1 %v2908_v5 }
  0x1f   :  { %188 = vmatprep.mubr.f32.mxu0 %v2908_v5  ;;  %474 = vmatpush1.msra.mxu1 %v419_v38 }
  0x20   :  { %475 = vmatprep.subr.mxu1 %v2908_v5 }
  0x21   :  { %476 = vmatpush1.msra.mxu1 %v418_v39 }
  0x22   :  { %2523 = vmatmul.mubr.msk.f32.gmra.mxu0 %vm80_vm1, %v38_v27  ;;  %477 = vmatprep.subr.mxu1 %v2908_v5 }
  0x23   :  { %194 = vmatprep.mubr.f32.mxu0 %v2908_v5  ;;  %478 = vmatpush1.msra.mxu1 %v417_v40 }
  0x24   :  { %479 = vmatprep.subr.mxu1 %v2908_v5 }
  0x25   :  { %480 = vmatpush1.msra.mxu1 %v416_v41 }
  0x26   :  { %2524 = vmatmul.mubr.msk.f32.gmra.mxu0 %vm80_vm1, %v39_v28  ;;  %481 = vmatprep.subr.mxu1 %v2908_v5 }
  0x27   :  { %200 = vmatprep.mubr.f32.mxu0 %v2908_v5  ;;  %482 = vmatpush1.msra.mxu1 %v415_v42 }
  0x28   :  { %483 = vmatprep.subr.mxu1 %v2908_v5 }
  0x29   :  { %484 = vmatpush1.msra.mxu1 %v414_v43 }
  0x2a   :  { %2525 = vmatmul.mubr.msk.f32.gmra.mxu0 %vm80_vm1, %v40_v29  ;;  %485 = vmatprep.subr.mxu1 %v2908_v5 }
  0x2b   :  { %206 = vmatprep.mubr.f32.mxu0 %v2908_v5  ;;  %486 = vmatpush1.msra.mxu1 %v413_v44 }
  0x2c   :  { %487 = vmatprep.subr.mxu1 %v2908_v5 }
  0x2d   :  { %488 = vmatpush1.msra.mxu1 %v412_v45 }
  0x2e   :  { %2526 = vmatmul.mubr.msk.f32.gmra.mxu0 %vm80_vm1, %v41_v30  ;;  %489 = vmatprep.subr.mxu1 %v2908_v5 }
  0x2f   :  { %212 = vmatprep.mubr.f32.mxu0 %v2908_v5  ;;  %490 = vmatpush1.msra.mxu1 %v411_v46 }
  0x30   :  { %491 = vmatprep.subr.mxu1 %v2908_v5 }
  0x31   :  { %492 = vmatpush1.msra.mxu1 %v410_v47 }
  0x32   :  { %2527 = vmatmul.mubr.msk.f32.gmra.mxu0 %vm80_vm1, %v42_v31  ;;  %493 = vmatprep.subr.mxu1 %v2908_v5 }
  0x33   :  { %218 = vmatprep.mubr.f32.mxu0 %v2908_v5  ;;  %494 = vmatpush1.msra.mxu1 %v409_v48 }
  0x34   :  { %501 = vmatprep.subr.mxu1 %v2908_v5 }
  0x35   :  { %502 = vmatpush2.msra.mxu1 %v437_v49 }
  0x36   :  { %2528 = vmatmul.mubr.msk.f32.gmra.mxu0 %vm80_vm1, %v43_v32  ;;  %503 = vmatprep.subr.mxu1 %v2908_v5 }
  0x37   :  { %504 = vmatpush2.msra.mxu1 %v436_v50 }
  0x38   :  { %505 = vmatprep.subr.mxu1 %v2908_v5 }
  0x39   :  { %506 = vmatpush2.msra.mxu1 %v435_v51 }
  0x3a   :  { %507 = vmatprep.subr.mxu1 %v2908_v5 }
  0x3b   :  { %508 = vmatpush2.msra.mxu1 %v434_v52 }
  0x3c   :  { %509 = vmatprep.subr.mxu1 %v2908_v5 }
  0x3d   :  { %510 = vmatpush2.msra.mxu1 %v433_v53 }
  0x3e   :  { %511 = vmatprep.subr.mxu1 %v2908_v5 }
  0x3f   :  { %512 = vmatpush2.msra.mxu1 %v432_v54 }
  0x40   :  { %513 = vmatprep.subr.mxu1 %v2908_v5 }
  0x41   :  { %514 = vmatpush2.msra.mxu1 %v431_v57 }
  0x42   :  { %515 = vmatprep.subr.mxu1 %v2908_v5 }
  0x43   :  { %516 = vmatpush2.msra.mxu1 %v430_v61 }
  0x44   :  { %517 = vmatprep.subr.mxu1 %v2908_v5 }
  0x45   :  { %518 = vmatpush2.msra.mxu1 %v429_v62 }
  0x46   :  { %519 = vmatprep.subr.mxu1 %v2908_v5 }
  0x47   :  { %520 = vmatpush2.msra.mxu1 %v428_v2 }
  0x48   :  { %521 = vmatprep.subr.mxu1 %v2908_v5 }
  0x49   :  { %522 = vmatpush2.msra.mxu1 %v427_v4 }
  0x4a   :  { %523 = vmatprep.subr.mxu1 %v2908_v5 }
  0x4b   :  { %524 = vmatpush2.msra.mxu1 %v426_v9 }
  0x4c   :  { %525 = vmatprep.subr.mxu1 %v2908_v5 }
  0x4d   :  { %526 = vmatpush2.msra.mxu1 %v425_v13 }
  0xda   :  { %v178_v1 = vpop.f32.mrf.mxu0 }
  0xdb   :  { %v3203_v6 = vadd.f32 %v178_v1, %v3188_v63 }
  0xdc   :  { %v180_v3 = vpop.f32.mrf.mxu0 }
  0xdd   :  { %v3206_v7 = vadd.f32 %v180_v3, %v3192_v0  ;;  %v225_v14 = vmax.f32 %v3203_v6, 0.0 }
  0xde   :  { %v184_v8 = vpop.f32.mrf.mxu0 }
  0xdf   :  { %v226_v10 = vmax.f32 %v3206_v7, 0.0  ;;  %v3214_v11 = vadd.f32 %v184_v8, %v3188_v63 }
  0xe0   :  { %v186_v12 = vpop.f32.mrf.mxu0 }
  0xe1   :  { %v227_v15 = vmax.f32 %v3214_v11, 0.0  ;;  %v187_v16 = vadd.f32 %v186_v12, %v3192_v0  ;;  %259 = vrot.lane.b32.xlu0 %v226_v10, %s2909_s29 }
  0xe2   :  { %v190_v17 = vpop.f32.mrf.mxu0 }
  0xe3   :  { %v2881_v18 = vpack.i.bf16 %v227_v15, %v225_v14  ;;  %v228_v19 = vmax.f32 %v187_v16, 0.0  ;;  %v3231_v20 = vadd.f32 %v190_v17, %v3188_v63 }
  0xe4   :  { %v192_v21 = vpop.f32.mrf.mxu0 }
  0xe5   :  { %v229_v22 = vmax.f32 %v3231_v20, 0.0  ;;  %v3235_v23 = vadd.f32 %v192_v21, %v3192_v0  ;;  %263 = vrot.lane.b32.xlu1 %v228_v19, %s2909_s29  ;;  %2882 = vrot.lane.b32.xlu0 %v2881_v18, %s2909_s29 }
  0xe6   :  { %v196_v24 = vpop.f32.mrf.mxu0 }
  0xe7   :  { %v230_v25 = vmax.f32 %v3235_v23, 0.0  ;;  %v3241_v26 = vadd.f32 %v196_v24, %v3188_v63 }
  0xe8   :  { %v198_v27 = vpop.f32.mrf.mxu0 }
  0xe9   :  { %v231_v28 = vmax.f32 %v3241_v26, 0.0  ;;  %v3245_v29 = vadd.f32 %v198_v27, %v3192_v0  ;;  %265 = vrot.lane.b32.xlu1 %v229_v22, %s2909_s29  ;;  %267 = vrot.lane.b32.xlu0 %v230_v25, %s2909_s29 }
  0xea   :  { %v202_v30 = vpop.f32.mrf.mxu0 }
  0xeb   :  { %v232_v31 = vmax.f32 %v3245_v29, 0.0  ;;  %v3253_v32 = vadd.f32 %v202_v30, %v3188_v63 }
  0xec   :  { %v204_v33 = vpop.f32.mrf.mxu0 }
  0xed   :  { %v233_v34 = vmax.f32 %v3253_v32, 0.0  ;;  %v3257_v35 = vadd.f32 %v204_v33, %v3192_v0  ;;  %269 = vrot.lane.b32.xlu1 %v231_v28, %s2909_s29  ;;  %271 = vrot.lane.b32.xlu0 %v232_v31, %s2909_s29 }
  0xee   :  { %v208_v36 = vpop.f32.mrf.mxu0 }
  0xef   :  { %v234_v37 = vmax.f32 %v3257_v35, 0.0  ;;  %v3267_v38 = vadd.f32 %v208_v36, %v3188_v63 }
  0xf0   :  { %v210_v39 = vpop.f32.mrf.mxu0 }
  0xf1   :  { %v235_v40 = vmax.f32 %v3267_v38, 0.0  ;;  %v3271_v41 = vadd.f32 %v210_v39, %v3192_v0  ;;  %273 = vrot.lane.b32.xlu1 %v233_v34, %s2909_s29  ;;  %275 = vrot.lane.b32.xlu0 %v234_v37, %s2909_s29 }
  0xf2   :  { %v214_v42 = vpop.f32.mrf.mxu0 }
  0xf3   :  { %v236_v43 = vmax.f32 %v3271_v41, 0.0  ;;  %v3281_v44 = vadd.f32 %v214_v42, %v3188_v63 }
  0xf4   :  { %v216_v45 = vpop.f32.mrf.mxu0 }
  0xf5   :  { %v237_v46 = vmax.f32 %v3281_v44, 0.0  ;;  %v3285_v47 = vadd.f32 %v216_v45, %v3192_v0  ;;  %277 = vrot.lane.b32.xlu1 %v235_v40, %s2909_s29  ;;  %279 = vrot.lane.b32.xlu0 %v236_v43, %s2909_s29 }
  0xf6   :  { %v220_v48 = vpop.f32.mrf.mxu0 }
  0xf7   :  { %v238_v49 = vmax.f32 %v3285_v47, 0.0  ;;  %v3295_v50 = vadd.f32 %v220_v48, %v3188_v63 }
  0xf8   :  { %v222_v51 = vpop.f32.mrf.mxu0 }
  0xf9   :  { %v239_v52 = vmax.f32 %v3295_v50, 0.0  ;;  %v3299_v53 = vadd.f32 %v222_v51, %v3192_v0  ;;  %281 = vrot.lane.b32.xlu1 %v237_v46, %s2909_s29  ;;  %283 = vrot.lane.b32.xlu0 %v238_v49, %s2909_s29 }
  0xfb   :  { %v240_v54 = vmax.f32 %v3299_v53, 0.0 }
  0xfd   :  { %285 = vrot.lane.b32.xlu1 %v239_v52, %s2909_s29  ;;  %287 = vrot.lane.b32.xlu0 %v240_v54, %s2909_s29 }
 0x153   :  { %v260_v55 = vpop.permute.xlu0 %259 }
 0x154   :  { %v315_v57 = vmax.f32 %v226_v10, %v260_v55 }
 0x156   :  { %v350_v1 = vrot.slane %v315_v57, 1 }
 0x157   :  { %v264_v60 = vpop.permute.xlu1 %263  ;;  %v2883_v61 = vpop.permute.xlu0 %2882 }
 0x158   :  { %v317_v62 = vmax.f32 %v228_v19, %v264_v60  ;;  %v2885_v63 = vunpack.i.h.bf16 %v2883_v61  ;;  %v2884_v0 = vunpack.i.l.bf16 %v2883_v61 }
 0x15a   :  { %v351_v2 = vrot.slane %v317_v62, 1  ;;  %v291_v3 = vsel %vm289_vm2, %v2885_v63, %v264_v60  ;;  %v290_v4 = vsel %vm289_vm2, %v2884_v0, %v260_v55 }
 0x15b   :  { %v316_v8 = vmax.f32 %v227_v15, %v291_v3  ;;  %v266_v9 = vpop.permute.xlu1 %265  ;;  %v268_v12 = vpop.permute.xlu0 %267  ;;  %v314_v7 = vmax.f32 %v225_v14, %v290_v4 }
 0x15c   :  { %v292_v10 = vsel %vm289_vm2, %v266_v9, %v268_v12  ;;  %v319_v13 = vmax.f32 %v230_v25, %v268_v12  ;;  %v352_v16 = vsel %vm346_vm3, %v350_v1, %v351_v2 }
 0x15d   :  { %v348_v17 = vrot.slane %v316_v8, 1  ;;  %v318_v18 = vmax.f32 %v229_v22, %v292_v10  ;;  %v394_v19 = vmax.f32 %v315_v57, %v352_v16  ;;  %v347_v21 = vrot.slane %v314_v7, 1 }
 0x15e   :  { %v355_v23 = vrot.slane %v319_v13, 1 }
 0x15f   :  { %v353_v11 = vrot.slane %v318_v18, 1  ;;  %v270_v15 = vpop.permute.xlu1 %269  ;;  %2529 = vmatprep.mubr.msk.f32.mxu1 %vm438_vm4, %v394_v19  ;;  %v272_v24 = vpop.permute.xlu0 %271  ;;  %v349_v6 = vsel %vm346_vm3, %v347_v21, %v348_v17 }
 0x160   :  { %v356_v14 = vsel %vm346_vm3, %v351_v2, %v355_v23  ;;  %v293_v25 = vsel %vm289_vm2, %v270_v15, %v272_v24  ;;  %v321_v27 = vmax.f32 %v232_v31, %v272_v24  ;;  %v393_v30 = vmax.f32 %v314_v7, %v349_v6 }
 0x161   :  { %v320_v20 = vmax.f32 %v231_v28, %v293_v25  ;;  %v396_v22 = vmax.f32 %v317_v62, %v356_v14  ;;  %v354_v33 = vsel %vm346_vm3, %v348_v17, %v353_v11  ;;  %v777_v25 = vld [vmem:[%s4778_s5 + $0xf8] sm:$0xff] }
 0x162   :  { %v359_v36 = vrot.slane %v321_v27, 1  ;;  %528 = vmatmul.mubr.f32.vlgmr.msra.gmra.mxu1 %v393_v30  ;;  %v395_v31 = vmax.f32 %v316_v8, %v354_v33  ;;  %v775_v30 = vld [vmem:[%s4778_s5 + $0xe8] sm:$0xff]  ;;  %900 = vmatprep.subr.mxu1 %v777_v25  ;;  %v772_v33 = vld [vmem:[%s4778_s5 + $0xd0] sm:$0xff] }
 0x163   :  { %v357_v39 = vrot.slane %v320_v20, 1  ;;  %v274_v42 = vpop.permute.xlu1 %273  ;;  %v276_v45 = vpop.permute.xlu0 %275  ;;  %2530 = vmatprep.mubr.msk.f32.mxu1 %vm438_vm4, %v396_v22  ;;  %v773_v22 = vld [vmem:[%s4778_s5 + $0xd8] sm:$0xff]  ;;  %v2572_v25 = vld [vmem:[%s4778_s5 + $0x1b0] sm:$0xff] }
 0x164   :  { %v360_v48 = vsel %vm346_vm3, %v355_v23, %v359_v36  ;;  %v294_v51 = vsel %vm289_vm2, %v274_v42, %v276_v45  ;;  %v323_v29 = vmax.f32 %v234_v37, %v276_v45  ;;  %v769_v42 = vld [vmem:[%s4778_s5 + $0xb8] sm:$0xff]  ;;  %v768_v45 = vld [vmem:[%s4778_s5 + $0xb0] sm:$0xff] }
 0x165   :  { %v322_v26 = vmax.f32 %v233_v34, %v294_v51  ;;  %v398_v28 = vmax.f32 %v319_v13, %v360_v48  ;;  %v358_v55 = vsel %vm346_vm3, %v353_v11, %v357_v39  ;;  %v767_v48 = vld [vmem:[%s4778_s5 + $0xa8] sm:$0xff]  ;;  %v766_v51 = vld [vmem:[%s4778_s5 + $0xa0] sm:$0xff] }
 0x166   :  { %v363_v57 = vrot.slane %v323_v29, 1  ;;  %533 = vmatmul.mubr.f32.gmra.mxu1 %v395_v31  ;;  %v397_v37 = vmax.f32 %v318_v18, %v358_v55  ;;  %v764_v31 = vld [vmem:[%s4778_s5 + $0x90] sm:$0xff]  ;;  %v761_v55 = vld [vmem:[%s4778_s5 + $0x78] sm:$0xff] }
 0x167   :  { %v361_v60 = vrot.slane %v322_v26, 1  ;;  %v278_v61 = vpop.permute.xlu1 %277  ;;  %v280_v62 = vpop.permute.xlu0 %279  ;;  %2531 = vmatprep.mubr.msk.f32.mxu1 %vm438_vm4, %v398_v28  ;;  %v762_v28 = vld [vmem:[%s4778_s5 + $0x80] sm:$0xff] }
 0x168   :  { %v364_v63 = vsel %vm346_vm3, %v359_v36, %v363_v57  ;;  %v295_v0 = vsel %vm289_vm2, %v278_v61, %v280_v62  ;;  %v325_v35 = vmax.f32 %v236_v43, %v280_v62  ;;  %v771_v36 = vld [vmem:[%s4778_s5 + $0xc8] sm:$0xff]  ;;  %v758_v61 = vld [vmem:[%s4778_s5 + $0x60] sm:$0xff]  ;;  %v757_v62 = vld [vmem:[%s4778_s5 + $0x58] sm:$0xff] }
 0x169   :  { %v324_v32 = vmax.f32 %v235_v40, %v295_v0  ;;  %v400_v34 = vmax.f32 %v321_v27, %v364_v63  ;;  %v362_v1 = vsel %vm346_vm3, %v357_v39, %v361_v60  ;;  %v776_v27 = vld [vmem:[%s4778_s5 + $0xf0] sm:$0xff]  ;;  %v770_v39 = vld [vmem:[%s4778_s5 + $0xc0] sm:$0xff]  ;;  %v755_v0 = vld [vmem:[%s4778_s5 + $0x48] sm:$0xff] }
 0x16a   :  { %v367_v2 = vrot.slane %v325_v35, 1  ;;  %538 = vmatmul.mubr.f32.gmra.mxu1 %v397_v37  ;;  %v399_v43 = vmax.f32 %v320_v20, %v362_v1  ;;  %v774_v20 = vld [vmem:[%s4778_s5 + $0xe0] sm:$0xff]  ;;  %v756_v63 = vld [vmem:[%s4778_s5 + $0x50] sm:$0xff]  ;;  %v753_v37 = vld [vmem:[%s4778_s5 + $0x38] sm:$0xff] }
 0x16b   :  { %v365_v3 = vrot.slane %v324_v32, 1  ;;  %v282_v4 = vpop.permute.xlu1 %281  ;;  %v284_v8 = vpop.permute.xlu0 %283  ;;  %2532 = vmatprep.mubr.msk.f32.mxu1 %vm438_vm4, %v400_v34  ;;  %901 = vmatpush1.msra.mxu1 %v776_v27  ;;  %v751_v34 = vld [vmem:[%s4778_s5 + $0x28] sm:$0xff]  ;;  %v750_v1 = vld [vmem:[%s4778_s5 + $0x20] sm:$0xff] }
 0x16c   :  { %v368_v9 = vsel %vm346_vm3, %v363_v57, %v367_v2  ;;  %v296_v12 = vsel %vm289_vm2, %v282_v4, %v284_v8  ;;  %v327_v41 = vmax.f32 %v238_v49, %v284_v8  ;;  %902 = vmatprep.subr.mxu1 %v775_v30  ;;  %v760_v57 = vld [vmem:[%s4778_s5 + $0x70] sm:$0xff]  ;;  %v2571_v27 = vld [vmem:[%s4778_s5 + $0x1a8] sm:$0xff]  ;;  %v2570_v30 = vld [vmem:[%s4778_s5 + $0x1a0] sm:$0xff] }
 0x16d   :  { %v326_v38 = vmax.f32 %v237_v46, %v296_v12  ;;  %v402_v40 = vmax.f32 %v323_v29, %v368_v9  ;;  %v366_v7 = vsel %vm346_vm3, %v361_v60, %v365_v3  ;;  %903 = vmatpush1.msra.mxu1 %v774_v20  ;;  %v765_v29 = vld [vmem:[%s4778_s5 + $0x98] sm:$0xff]  ;;  %v759_v60 = vld [vmem:[%s4778_s5 + $0x68] sm:$0xff] }
 0x16e   :  { %v371_v10 = vrot.slane %v327_v41, 1  ;;  %543 = vmatmul.mubr.f32.gmra.mxu1 %v399_v43  ;;  %v401_v49 = vmax.f32 %v322_v26, %v366_v7  ;;  %904 = vmatprep.subr.mxu1 %v773_v22  ;;  %v763_v26 = vld [vmem:[%s4778_s5 + $0x88] sm:$0xff]  ;;  %v575_v20 = vld [vmem:[%s4776_s3 + $0x38] sm:$0xff] }
 0x16f   :  { %v369_v13 = vrot.slane %v326_v38, 1  ;;  %v286_v16 = vpop.permute.xlu1 %285  ;;  %v288_v17 = vpop.permute.xlu0 %287  ;;  %2533 = vmatprep.mubr.msk.f32.mxu1 %vm438_vm4, %v402_v40  ;;  %905 = vmatpush1.msra.mxu1 %v772_v33  ;;  %v2569_v22 = vld [vmem:[%s4778_s5 + $0x198] sm:$0xff]  ;;  %v576_v33 = vld [vmem:[%s4776_s3 + $0x40] sm:$0xff] }
 0x170   :  { %v372_v18 = vsel %vm346_vm3, %v367_v2, %v371_v10  ;;  %v297_v19 = vsel %vm289_vm2, %v286_v16, %v288_v17  ;;  %v329_v47 = vmax.f32 %v240_v54, %v288_v17  ;;  %v568_v54 = vld [vmem:[%s4776_s3] sm:$0xff]  ;;  %906 = vmatprep.subr.mxu1 %v771_v36  ;;  %v749_v2 = vld [vmem:[%s4778_s5 + $0x18] sm:$0xff]  ;;  %v2568_v36 = vld [vmem:[%s4778_s5 + $0x190] sm:$0xff] }
 0x171   :  { %v328_v44 = vmax.f32 %v239_v52, %v297_v19  ;;  %v404_v46 = vmax.f32 %v325_v35, %v372_v18  ;;  %v370_v21 = vsel %vm346_vm3, %v365_v3, %v369_v13  ;;  %2859 = vmatprep.mubr.msk.f32.mxu0 %vm580_vm5, %v568_v54  ;;  %907 = vmatpush1.msra.mxu1 %v770_v39  ;;  %v754_v35 = vld [vmem:[%s4778_s5 + $0x40] sm:$0xff]  ;;  %v574_v54 = vld [vmem:[%s4776_s3 + $0x30] sm:$0xff]  ;;  %v2567_v39 = vld [vmem:[%s4778_s5 + $0x188] sm:$0xff] }
 0x172   :  { %v375_v23 = vrot.slane %v329_v47, 1  ;;  %548 = vmatmul.mubr.f32.gmra.mxu1 %v401_v49  ;;  %v403_v24 = vmax.f32 %v324_v32, %v370_v21  ;;  %908 = vmatprep.subr.mxu1 %v769_v42  ;;  %v752_v32 = vld [vmem:[%s4778_s5 + $0x30] sm:$0xff]  ;;  %v2581_v49 = vld [vmem:[%s4778_s5 + $0x1f8] sm:$0xff]  ;;  %v2579_v21 = vld [vmem:[%s4778_s5 + $0x1e8] sm:$0xff] }
 0x173   :  { %v373_v11 = vrot.slane %v328_v44, 1  ;;  %2534 = vmatprep.mubr.msk.f32.mxu1 %vm438_vm4, %v404_v46  ;;  %909 = vmatpush1.msra.mxu1 %v768_v45  ;;  %v2580_v46 = vld [vmem:[%s4778_s5 + $0x1f0] sm:$0xff]  ;;  %v2566_v42 = vld [vmem:[%s4778_s5 + $0x180] sm:$0xff]  ;;  %v577_v45 = vld [vmem:[%s4776_s3 + $0x48] sm:$0xff] }
 0x174   :  { %v376_v15 = vsel %vm346_vm3, %v371_v10, %v375_v23  ;;  %v408_v50 = vmax.f32 %v329_v47, %v375_v23  ;;  %910 = vmatprep.subr.mxu1 %v767_v48  ;;  %v569_v47 = vld [vmem:[%s4776_s3 + $0x8] sm:$0xff]  ;;  %v2578_v23 = vld [vmem:[%s4778_s5 + $0x1e0] sm:$0xff]  ;;  %v2565_v48 = vld [vmem:[%s4778_s5 + $0x178] sm:$0xff] }
 0x175   :  { %v406_v6 = vmax.f32 %v327_v41, %v376_v15  ;;  %v374_v14 = vsel %vm346_vm3, %v369_v13, %v373_v11  ;;  %v407_v52 = vmax.f32 %v328_v44, %v373_v11  ;;  %911 = vmatpush1.msra.mxu1 %v766_v51  ;;  %v570_v44 = vld [vmem:[%s4776_s3 + $0x10] sm:$0xff]  ;;  %v571_v11 = vld [vmem:[%s4776_s3 + $0x18] sm:$0xff] }
 0x176   :  { %553 = vmatmul.mubr.f32.gmra.mxu1 %v403_v24  ;;  %v405_v53 = vmax.f32 %v326_v38, %v374_v14  ;;  %912 = vmatprep.subr.mxu1 %v765_v29  ;;  %v2577_v15 = vld [vmem:[%s4778_s5 + $0x1d8] sm:$0xff]  ;;  %v572_v24 = vld [vmem:[%s4776_s3 + $0x20] sm:$0xff]  ;;  %v2575_v14 = vld [vmem:[%s4778_s5 + $0x1c8] sm:$0xff] }
 0x177   :  { %2535 = vmatprep.mubr.msk.f32.mxu1 %vm438_vm4, %v406_v6  ;;  %913 = vmatpush1.msra.mxu1 %v764_v31  ;;  %v2576_v6 = vld [vmem:[%s4778_s5 + $0x1d0] sm:$0xff]  ;;  %v2563_v31 = vld [vmem:[%s4778_s5 + $0x168] sm:$0xff] }
 0x178   :  { %914 = vmatprep.subr.mxu1 %v763_v26  ;;  %v578_v51 = vld [vmem:[%s4776_s3 + $0x50] sm:$0xff]  ;;  %v2562_v26 = vld [vmem:[%s4778_s5 + $0x160] sm:$0xff] }
 0x179   :  { %915 = vmatpush1.msra.mxu1 %v762_v28  ;;  %v2564_v29 = vld [vmem:[%s4778_s5 + $0x170] sm:$0xff]  ;;  %v579_v28 = vld [vmem:[%s4776_s3 + $0x58] sm:$0xff] }
 0x17a   :  { %558 = vmatmul.mubr.f32.gmra.mxu1 %v405_v53  ;;  %916 = vmatprep.subr.mxu1 %v761_v55  ;;  %v2574_v53 = vld [vmem:[%s4778_s5 + $0x1c0] sm:$0xff]  ;;  %v2561_v55 = vld [vmem:[%s4778_s5 + $0x158] sm:$0xff] }
 0x17b   :  { %2536 = vmatprep.mubr.msk.f32.mxu1 %vm438_vm4, %v408_v50  ;;  %917 = vmatpush1.msra.mxu1 %v760_v57  ;;  %v573_v50 = vld [vmem:[%s4776_s3 + $0x28] sm:$0xff]  ;;  %v2560_v57 = vld [vmem:[%s4778_s5 + $0x150] sm:$0xff] }
 0x17c   :  { %918 = vmatprep.subr.mxu1 %v759_v60  ;;  %v2559_v60 = vld [vmem:[%s4778_s5 + $0x148] sm:$0xff] }
 0x17d   :  { %919 = vmatpush1.msra.mxu1 %v758_v61  ;;  %v748_v61 = vld [vmem:[%s4778_s5 + $0x10] sm:$0xff] }
 0x17e   :  { %563 = vmatmul.mubr.f32.gmra.mxu1 %v407_v52  ;;  %920 = vmatprep.subr.mxu1 %v757_v62  ;;  %v2573_v52 = vld [vmem:[%s4778_s5 + $0x1b8] sm:$0xff]  ;;  %v2558_v62 = vld [vmem:[%s4778_s5 + $0x140] sm:$0xff] }
 0x17f   :  { %964 = vmatprep.mubr.f32.mxu1 %v2908_v5  ;;  %921 = vmatpush1.msra.mxu1 %v756_v63  ;;  %v747_v63 = vld [vmem:[%s4778_s5 + $0x8] sm:$0xff] }
 0x180   :  { %922 = vmatprep.subr.mxu1 %v755_v0  ;;  %v2557_v0 = vld [vmem:[%s4778_s5 + $0x138] sm:$0xff] }
 0x181   :  { %923 = vmatpush1.msra.mxu1 %v754_v35  ;;  %v746_v35 = vld [vmem:[%s4778_s5] sm:$0xff] }
 0x182   :  { %924 = vmatprep.subr.mxu1 %v753_v37  ;;  %v2556_v37 = vld [vmem:[%s4778_s5 + $0x130] sm:$0xff] }
 0x183   :  { %925 = vmatpush1.msra.mxu1 %v752_v32  ;;  %v2555_v32 = vld [vmem:[%s4778_s5 + $0x128] sm:$0xff] }
 0x184   :  { %926 = vmatprep.subr.mxu1 %v751_v34  ;;  %v2554_v34 = vld [vmem:[%s4778_s5 + $0x120] sm:$0xff] }
 0x185   :  { %927 = vmatpush1.msra.mxu1 %v750_v1  ;;  %v2553_v1 = vld [vmem:[%s4778_s5 + $0x118] sm:$0xff] }
 0x186   :  { %928 = vmatprep.subr.mxu1 %v749_v2  ;;  %v2552_v2 = vld [vmem:[%s4778_s5 + $0x110] sm:$0xff] }
 0x187   :  { %929 = vmatpush1.msra.mxu1 %v748_v61 }
 0x188   :  { %930 = vmatprep.subr.mxu1 %v747_v63 }
 0x189   :  { %931 = vmatpush1.msra.mxu1 %v746_v35 }
 0x18a   :  { %1353 = vmatprep.subr.mxu1 %v2908_v5 }
 0x222   :  { %v529_v3 = vpop.f32.mrf.mxu1 }
 0x224   :  { %v531_v4 = vpop.f32.mrf.mxu1 }
 0x225   :  { %v2550_v4 = vld [vmem:[%s4778_s5 + $0x100] sm:$0xff] }
 0x226   :  { %v534_v8 = vpop.f32.mrf.mxu1 }
 0x228   :  { %v536_v9 = vpop.f32.mrf.mxu1 }
 0x22a   :  { %v539_v12 = vpop.f32.mrf.mxu1 }
 0x22c   :  { %v541_v41 = vpop.f32.mrf.mxu1 }
 0x22e   :  { %v544_v43 = vpop.f32.mrf.mxu1 }
 0x230   :  { %v546_v38 = vpop.f32.mrf.mxu1 }
 0x232   :  { %v549_v40 = vpop.f32.mrf.mxu1 }
 0x234   :  { %v551_v7 = vpop.f32.mrf.mxu1 }
 0x236   :  { %v554_v10 = vpop.f32.mrf.mxu1 }
 0x238   :  { %v556_v13 = vpop.f32.mrf.mxu1 }
 0x239   :  { %v2610_v13 = vld [vmem:[%s4778_s5 + $0x2e0] sm:$0xff] }
 0x23a   :  { %v559_v16 = vpop.f32.mrf.mxu1 }
 0x23c   :  { %v561_v17 = vpop.f32.mrf.mxu1 }
 0x23e   :  { %v564_v18 = vpop.f32.mrf.mxu1 }
 0x23f   :  { %2843 = vmatprep.subr.msk.mxu0 %vm617_vm6, %v564_v18 }
 0x240   :  { %v566_v19 = vpop.f32.mrf.mxu1  ;;  %2844 = vmatpush3.msk.msra.mxu0 %vm617_vm6, %v564_v18  ;;  %v2608_v18 = vld [vmem:[%s4778_s5 + $0x2d0] sm:$0xff] }
 0x241   :  { %2845 = vmatprep.subr.mxu0 %v559_v16  ;;  %v2607_v19 = vld [vmem:[%s4778_s5 + $0x2c8] sm:$0xff] }
 0x242   :  { %2846 = vmatpush3.msra.mxu0 %v559_v16  ;;  %v2609_v16 = vld [vmem:[%s4778_s5 + $0x2d8] sm:$0xff] }
 0x243   :  { %2847 = vmatprep.subr.mxu0 %v554_v10 }
 0x244   :  { %2848 = vmatpush3.msra.mxu0 %v554_v10  ;;  %v2611_v10 = vld [vmem:[%s4778_s5 + $0x2e8] sm:$0xff] }
 0x245   :  { %2849 = vmatprep.subr.mxu0 %v549_v40 }
 0x246   :  { %2850 = vmatpush3.msra.mxu0 %v549_v40  ;;  %v2612_v40 = vld [vmem:[%s4778_s5 + $0x2f0] sm:$0xff] }
 0x247   :  { %2851 = vmatprep.subr.mxu0 %v544_v43 }
 0x248   :  { %2852 = vmatpush3.msra.mxu0 %v544_v43 }
 0x249   :  { %2853 = vmatprep.subr.mxu0 %v539_v12 }
 0x24a   :  { %2854 = vmatpush3.msra.mxu0 %v539_v12 }
 0x24b   :  { %2855 = vmatprep.subr.mxu0 %v534_v8 }
 0x24c   :  { %2856 = vmatpush3.msra.mxu0 %v534_v8  ;;  %v2613_v8 = vld [vmem:[%s4778_s5 + $0x2f8] sm:$0xff] }
 0x24d   :  { %2857 = vmatprep.subr.mxu0 %v529_v3 }
 0x24e   :  { %2858 = vmatpush3.msra.mxu0 %v529_v3  ;;  %v2551_v3 = vld [vmem:[%s4778_s5 + $0x108] sm:$0xff] }
 0x24f   :  { %2860 = vmatmul.mubr.msk.f32.vlgmr.msra.gmra.mxu0 %vm580_vm5, %v569_v47  ;;  %811 = vmatprep.subr.mxu0 %v2581_v49  ;;  %v2606_v47 = vld [vmem:[%s4778_s5 + $0x2c0] sm:$0xff] }
 0x250   :  { %2862 = vmatprep.mubr.msk.f32.mxu0 %vm580_vm5, %v570_v44  ;;  %812 = vmatpush1.msra.mxu0 %v2580_v46  ;;  %v2605_v44 = vld [vmem:[%s4778_s5 + $0x2b8] sm:$0xff]  ;;  %v2604_v46 = vld [vmem:[%s4778_s5 + $0x2b0] sm:$0xff] }
 0x251   :  { %813 = vmatprep.subr.mxu0 %v2579_v21  ;;  %v2603_v21 = vld [vmem:[%s4778_s5 + $0x2a8] sm:$0xff] }
 0x252   :  { %814 = vmatpush1.msra.mxu0 %v2578_v23  ;;  %v2602_v23 = vld [vmem:[%s4778_s5 + $0x2a0] sm:$0xff] }
 0x253   :  { %2863 = vmatmul.mubr.msk.f32.gmra.mxu0 %vm580_vm5, %v571_v11  ;;  %815 = vmatprep.subr.mxu0 %v2577_v15  ;;  %v2601_v11 = vld [vmem:[%s4778_s5 + $0x298] sm:$0xff]  ;;  %v2600_v15 = vld [vmem:[%s4778_s5 + $0x290] sm:$0xff] }
 0x254   :  { %2865 = vmatprep.mubr.msk.f32.mxu0 %vm580_vm5, %v572_v24  ;;  %816 = vmatpush1.msra.mxu0 %v2576_v6  ;;  %v2599_v24 = vld [vmem:[%s4778_s5 + $0x288] sm:$0xff]  ;;  %v2598_v6 = vld [vmem:[%s4778_s5 + $0x280] sm:$0xff] }
 0x255   :  { %817 = vmatprep.subr.mxu0 %v2575_v14  ;;  %v2597_v14 = vld [vmem:[%s4778_s5 + $0x278] sm:$0xff] }
 0x256   :  { %818 = vmatpush1.msra.mxu0 %v2574_v53  ;;  %v2596_v53 = vld [vmem:[%s4778_s5 + $0x270] sm:$0xff] }
 0x257   :  { %2866 = vmatmul.mubr.msk.f32.gmra.mxu0 %vm580_vm5, %v573_v50  ;;  %819 = vmatprep.subr.mxu0 %v2573_v52  ;;  %v2595_v50 = vld [vmem:[%s4778_s5 + $0x268] sm:$0xff]  ;;  %v2594_v52 = vld [vmem:[%s4778_s5 + $0x260] sm:$0xff] }
 0x258   :  { %2868 = vmatprep.mubr.msk.f32.mxu0 %vm580_vm5, %v574_v54  ;;  %820 = vmatpush1.msra.mxu0 %v2572_v25  ;;  %v2593_v54 = vld [vmem:[%s4778_s5 + $0x258] sm:$0xff]  ;;  %v2592_v25 = vld [vmem:[%s4778_s5 + $0x250] sm:$0xff] }
 0x259   :  { %821 = vmatprep.subr.mxu0 %v2571_v27  ;;  %v2591_v27 = vld [vmem:[%s4778_s5 + $0x248] sm:$0xff] }
 0x25a   :  { %822 = vmatpush1.msra.mxu0 %v2570_v30  ;;  %v2590_v30 = vld [vmem:[%s4778_s5 + $0x240] sm:$0xff] }
 0x25b   :  { %2869 = vmatmul.mubr.msk.f32.gmra.mxu0 %vm580_vm5, %v575_v20  ;;  %823 = vmatprep.subr.mxu0 %v2569_v22  ;;  %v2589_v20 = vld [vmem:[%s4778_s5 + $0x238] sm:$0xff]  ;;  %v2588_v22 = vld [vmem:[%s4778_s5 + $0x230] sm:$0xff] }
 0x25c   :  { %2871 = vmatprep.mubr.msk.f32.mxu0 %vm580_vm5, %v576_v33  ;;  %824 = vmatpush1.msra.mxu0 %v2568_v36  ;;  %v2587_v33 = vld [vmem:[%s4778_s5 + $0x228] sm:$0xff]  ;;  %v2586_v36 = vld [vmem:[%s4778_s5 + $0x220] sm:$0xff] }
 0x25d   :  { %825 = vmatprep.subr.mxu0 %v2567_v39  ;;  %v2585_v39 = vld [vmem:[%s4778_s5 + $0x218] sm:$0xff] }
 0x25e   :  { %826 = vmatpush1.msra.mxu0 %v2566_v42  ;;  %v2584_v42 = vld [vmem:[%s4778_s5 + $0x210] sm:$0xff] }
 0x25f   :  { %2872 = vmatmul.mubr.msk.f32.gmra.mxu0 %vm580_vm5, %v577_v45  ;;  %827 = vmatprep.subr.mxu0 %v2565_v48  ;;  %v2583_v48 = vld [vmem:[%s4778_s5 + $0x208] sm:$0xff] }
 0x260   :  { %2874 = vmatprep.mubr.msk.f32.mxu0 %vm580_vm5, %v578_v51  ;;  %828 = vmatpush1.msra.mxu0 %v2564_v29  ;;  %v2582_v51 = vld [vmem:[%s4778_s5 + $0x200] sm:$0xff] }
 0x261   :  { %829 = vmatprep.subr.mxu0 %v2563_v31 }
 0x262   :  { %830 = vmatpush1.msra.mxu0 %v2562_v26 }
 0x263   :  { %2875 = vmatmul.mubr.msk.f32.gmra.mxu0 %vm580_vm5, %v579_v28  ;;  %831 = vmatprep.subr.mxu0 %v2561_v55 }
 0x264   :  { %832 = vmatpush1.msra.mxu0 %v2560_v57  ;;  %875 = vmatprep.mubr.f32.mxu0 %v2908_v5 }
 0x265   :  { %833 = vmatprep.subr.mxu0 %v2559_v60 }
 0x266   :  { %834 = vmatpush1.msra.mxu0 %v2558_v62 }
 0x267   :  { %835 = vmatprep.subr.mxu0 %v2557_v0 }
 0x268   :  { %836 = vmatpush1.msra.mxu0 %v2556_v37 }
 0x269   :  { %837 = vmatprep.subr.mxu0 %v2555_v32 }
 0x26a   :  { %838 = vmatpush1.msra.mxu0 %v2554_v34 }
 0x26b   :  { %839 = vmatprep.subr.mxu0 %v2553_v1 }
 0x26c   :  { %840 = vmatpush1.msra.mxu0 %v2552_v2 }
 0x26d   :  { %841 = vmatprep.subr.mxu0 %v2551_v3 }
 0x26e   :  { %842 = vmatpush1.msra.mxu0 %v2550_v4 }
 0x26f   :  { %1022 = vmatprep.subr.mxu0 %v2613_v8 }
 0x30f   :  { %v2861_v9 = vpop.f32.mrf.mxu0 }
 0x311   :  { %v687_v12 = vpop.f32.mrf.mxu0 }
 0x312   :  { %965 = vmatmul.mubr.f32.vlgmr.msra.gmra.mxu1 %v687_v12 }
 0x313   :  { %v2864_v41 = vpop.f32.mrf.mxu0  ;;  %970 = vmatprep.mubr.f32.mxu1 %v2908_v5 }
 0x315   :  { %v697_v43 = vpop.f32.mrf.mxu0 }
 0x316   :  { %971 = vmatmul.mubr.f32.gmra.mxu1 %v2861_v9  ;;  %v1119_v9 = vld [vmem:[%s4779_s6] sm:$0x3]  ;;  %s2910_s6 = smov 112  }
 0x317   :  { %v2867_v38 = vpop.f32.mrf.mxu0  ;;  %976 = vmatprep.mubr.f32.mxu1 %v2908_v5 }
 0x319   :  { %v707_v7 = vpop.f32.mrf.mxu0 }
 0x31a   :  { %876 = vmatmul.mubr.f32.vlgmr.msra.gmra.mxu0 %v707_v7  ;;  %977 = vmatmul.mubr.f32.gmra.mxu1 %v697_v43  ;;  %v1124_v7 = vrot.slane %v1119_v9, %v72_v58 }
 0x31b   :  { %1023 = vmatpush1.msra.mxu0 %v2612_v40  ;;  %881 = vmatprep.mubr.f32.mxu0 %v2908_v5  ;;  %v2870_v17 = vpop.f32.mrf.mxu0 }
 0x31c   :  { %1024 = vmatprep.subr.mxu0 %v2611_v10  ;;  %982 = vmatprep.mubr.f32.mxu1 %v2908_v5 }
 0x31d   :  { %1025 = vmatpush1.msra.mxu0 %v2610_v13  ;;  %v717_v49 = vpop.f32.mrf.mxu0  ;;  %v1128_v13 = vrot.slane %v1119_v9, %v76_v59 }
 0x31e   :  { %1026 = vmatprep.subr.mxu0 %v2609_v16  ;;  %882 = vmatmul.mubr.f32.gmra.mxu0 %v2867_v38 }
 0x31f   :  { %983 = vmatmul.mubr.f32.gmra.mxu1 %v2864_v41  ;;  %1027 = vmatpush1.msra.mxu0 %v2608_v18  ;;  %v2873_v45 = vpop.f32.mrf.mxu0 }
 0x320   :  { %1028 = vmatprep.subr.mxu0 %v2607_v19  ;;  %887 = vmatprep.mubr.f32.mxu0 %v2908_v5 }
 0x321   :  { %1029 = vmatpush1.msra.mxu0 %v2606_v47  ;;  %v727_v29 = vpop.f32.mrf.mxu0 }
 0x322   :  { %1030 = vmatprep.subr.mxu0 %v2605_v44  ;;  %888 = vmatmul.mubr.f32.gmra.mxu0 %v717_v49 }
 0x323   :  { %1031 = vmatpush1.msra.mxu0 %v2604_v46  ;;  %893 = vmatprep.mubr.f32.mxu0 %v2908_v5  ;;  %v2876_v31 = vpop.f32.mrf.mxu0 }
 0x324   :  { %1032 = vmatprep.subr.mxu0 %v2603_v21 }
 0x325   :  { %1033 = vmatpush1.msra.mxu0 %v2602_v23  ;;  %v737_v26 = vpop.f32.mrf.mxu0 }
 0x326   :  { %1034 = vmatprep.subr.mxu0 %v2601_v11  ;;  %894 = vmatmul.mubr.f32.gmra.mxu0 %v2870_v17 }
 0x327   :  { %1035 = vmatpush1.msra.mxu0 %v2600_v15  ;;  %1086 = vmatprep.mubr.f32.mxu0 %v2908_v5 }
 0x328   :  { %1036 = vmatprep.subr.mxu0 %v2599_v24 }
 0x329   :  { %1037 = vmatpush1.msra.mxu0 %v2598_v6 }
 0x32a   :  { %1038 = vmatprep.subr.mxu0 %v2597_v14 }
 0x32b   :  { %1039 = vmatpush1.msra.mxu0 %v2596_v53 }
 0x32c   :  { %1040 = vmatprep.subr.mxu0 %v2595_v50 }
 0x32d   :  { %1041 = vmatpush1.msra.mxu0 %v2594_v52 }
 0x32e   :  { %1042 = vmatprep.subr.mxu0 %v2593_v54 }
 0x32f   :  { %1043 = vmatpush1.msra.mxu0 %v2592_v25 }
 0x330   :  { %1044 = vmatprep.subr.mxu0 %v2591_v27 }
 0x331   :  { %1045 = vmatpush1.msra.mxu0 %v2590_v30 }
 0x332   :  { %1046 = vmatprep.subr.mxu0 %v2589_v20 }
 0x333   :  { %1047 = vmatpush1.msra.mxu0 %v2588_v22 }
 0x334   :  { %1048 = vmatprep.subr.mxu0 %v2587_v33 }
 0x335   :  { %1049 = vmatpush1.msra.mxu0 %v2586_v36 }
 0x336   :  { %1050 = vmatprep.subr.mxu0 %v2585_v39 }
 0x337   :  { %1051 = vmatpush1.msra.mxu0 %v2584_v42 }
 0x338   :  { %1052 = vmatprep.subr.mxu0 %v2583_v48 }
 0x339   :  { %1053 = vmatpush1.msra.mxu0 %v2582_v51  ;;  %v1335_v51 = vld [vmem:[%s4781_s8 + $0x78] sm:$0xff] }
 0x33a   :  { %1087 = vmatmul.mubr.f32.vlgmr.msra.gmra.mxu0 %v727_v29  ;;  %v1334_v29 = vld [vmem:[%s4781_s8 + $0x70] sm:$0xff]  ;;  %1354 = vmatpush1.msra.mxu1 %v1335_v51 }
 0x33b   :  { %1092 = vmatprep.mubr.f32.mxu0 %v2908_v5  ;;  %1355 = vmatprep.subr.mxu1 %v2908_v5 }
 0x33c   :  { %1356 = vmatpush1.msra.mxu1 %v1334_v29 }
 0x33d   :  { %1357 = vmatprep.subr.mxu1 %v2908_v5 }
 0x33e   :  { %1093 = vmatmul.mubr.f32.gmra.mxu0 %v2873_v45 }
 0x33f   :  { %1098 = vmatprep.mubr.f32.mxu0 %v2908_v5 }
 0x342   :  { %1099 = vmatmul.mubr.f32.gmra.mxu0 %v737_v26  ;;  %v1332_v26 = vld [vmem:[%s4781_s8 + $0x60] sm:$0xff] }
 0x343   :  { %1104 = vmatprep.mubr.f32.mxu0 %v2908_v5 }
 0x346   :  { %1105 = vmatmul.mubr.f32.gmra.mxu0 %v2876_v31  ;;  %v1333_v31 = vld [vmem:[%s4781_s8 + $0x68] sm:$0xff] }
 0x347   :  { %1313 = vmatprep.mubr.f32.mxu0 %v2908_v5  ;;  %1358 = vmatpush1.msra.mxu1 %v1333_v31 }
 0x348   :  { %1359 = vmatprep.subr.mxu1 %v2908_v5 }
 0x349   :  { %1360 = vmatpush1.msra.mxu1 %v1332_v26  ;;  %v1338_v26 = vld [vmem:[%s4781_s8 + $0x90] sm:$0xff] }
 0x34a   :  { %1361 = vmatprep.subr.mxu1 %v2908_v5 }
 0x3d2   :  { %v966_v61 = vpop.f32.mrf.mxu1 }
 0x3d4   :  { %v968_v63 = vpop.f32.mrf.mxu1 }
 0x3d6   :  { %v972_v35 = vpop.f32.mrf.mxu1 }
 0x3d8   :  { %v974_v32 = vpop.f32.mrf.mxu1 }
 0x3da   :  { %v877_v28 = vpop.f32.mrf.mxu0  ;;  %v978_v1 = vpop.f32.mrf.mxu1 }
 0x3db   :  { %v967_v24 = vadd.f32 %v966_v61, %v877_v28  ;;  %v1331_v28 = vld [vmem:[%s4781_s8 + $0x58] sm:$0xff] }
 0x3dc   :  { %v879_v55 = vpop.f32.mrf.mxu0  ;;  %v980_v4 = vpop.f32.mrf.mxu1  ;;  %1362 = vmatpush1.msra.mxu1 %v1331_v28  ;;  %v1327_v61 = vld [vmem:[%s4781_s8 + $0x38] sm:$0xff] }
 0x3dd   :  { %v969_v50 = vadd.f32 %v968_v63, %v879_v55  ;;  %v1330_v55 = vld [vmem:[%s4781_s8 + $0x50] sm:$0xff]  ;;  %1363 = vmatprep.subr.mxu1 %v2908_v5  ;;  %v1325_v63 = vld [vmem:[%s4781_s8 + $0x28] sm:$0xff] }
 0x3de   :  { %v883_v57 = vpop.f32.mrf.mxu0  ;;  %1364 = vmatpush1.msra.mxu1 %v1330_v55 }
 0x3df   :  { %v984_v41 = vpop.f32.mrf.mxu1  ;;  %v973_v17 = vadd.f32 %v972_v35, %v883_v57  ;;  %v1329_v57 = vld [vmem:[%s4781_s8 + $0x48] sm:$0xff]  ;;  %1365 = vmatprep.subr.mxu1 %v2908_v5  ;;  %v1323_v35 = vld [vmem:[%s4781_s8 + $0x18] sm:$0xff] }
 0x3e0   :  { %v885_v60 = vpop.f32.mrf.mxu0  ;;  %1366 = vmatpush1.msra.mxu1 %v1329_v57 }
 0x3e1   :  { %v986_v18 = vpop.f32.mrf.mxu1  ;;  %v975_v44 = vadd.f32 %v974_v32, %v885_v60  ;;  %v1328_v60 = vld [vmem:[%s4781_s8 + $0x40] sm:$0xff]  ;;  %1367 = vmatprep.subr.mxu1 %v2908_v5  ;;  %v1321_v32 = vld [vmem:[%s4781_s8 + $0x8] sm:$0xff] }
 0x3e2   :  { %v889_v62 = vpop.f32.mrf.mxu0  ;;  %1368 = vmatpush1.msra.mxu1 %v1328_v60  ;;  %v1238_v60 = vld [vmem:[%s4780_s7] sm:$0x3] }
 0x3e3   :  { %v979_v43 = vadd.f32 %v978_v1, %v889_v62  ;;  %1369 = vmatprep.subr.mxu1 %v2908_v5  ;;  %v1326_v62 = vld [vmem:[%s4781_s8 + $0x30] sm:$0xff]  ;;  %v1349_v1 = vld [vmem:[%s4781_s8 + $0xe8] sm:$0xff] }
 0x3e4   :  { %v891_v0 = vpop.f32.mrf.mxu0  ;;  %1370 = vmatpush1.msra.mxu1 %v1327_v61  ;;  %v1424_v61 = vld [vmem:[%s4780_s7 + $0x2] sm:$0x3] }
 0x3e5   :  { %v981_v40 = vadd.f32 %v980_v4, %v891_v0  ;;  %1371 = vmatprep.subr.mxu1 %v2908_v5  ;;  %v1324_v0 = vld [vmem:[%s4781_s8 + $0x20] sm:$0xff] }
 0x3e6   :  { %v895_v37 = vpop.f32.mrf.mxu0  ;;  %1372 = vmatpush1.msra.mxu1 %v1326_v62  ;;  %v2637_v62 = vld [vmem:[%s4781_s8 + $0x168] sm:$0xff] }
 0x3e7   :  { %v985_v19 = vadd.f32 %v984_v41, %v895_v37  ;;  %1373 = vmatprep.subr.mxu1 %v2908_v5  ;;  %v1322_v37 = vld [vmem:[%s4781_s8 + $0x10] sm:$0xff] }
 0x3e8   :  { %v897_v34 = vpop.f32.mrf.mxu0  ;;  %1374 = vmatpush1.msra.mxu1 %v1325_v63  ;;  %v2636_v63 = vld [vmem:[%s4781_s8 + $0x160] sm:$0xff] }
 0x3e9   :  { %v987_v46 = vadd.f32 %v986_v18, %v897_v34  ;;  %1375 = vmatprep.subr.mxu1 %v2908_v5  ;;  %v1320_v34 = vld [vmem:[%s4781_s8] sm:$0xff] }
 0x3ea   :  { %1376 = vmatpush1.msra.mxu1 %v1324_v0  ;;  %v2635_v0 = vld [vmem:[%s4781_s8 + $0x158] sm:$0xff] }
 0x3eb   :  { %1377 = vmatprep.subr.mxu1 %v2908_v5 }
 0x3ec   :  { %1378 = vmatpush1.msra.mxu1 %v1323_v35  ;;  %v2634_v35 = vld [vmem:[%s4781_s8 + $0x150] sm:$0xff] }
 0x3ed   :  { %1379 = vmatprep.subr.mxu1 %v2908_v5 }
 0x3ee   :  { %1380 = vmatpush1.msra.mxu1 %v1322_v37  ;;  %v2633_v37 = vld [vmem:[%s4781_s8 + $0x148] sm:$0xff] }
 0x3ef   :  { %1381 = vmatprep.subr.mxu1 %v2908_v5 }
 0x3f0   :  { %1382 = vmatpush1.msra.mxu1 %v1321_v32  ;;  %v2632_v32 = vld [vmem:[%s4781_s8 + $0x140] sm:$0xff] }
 0x3f1   :  { %1383 = vmatprep.subr.mxu1 %v2908_v5 }
 0x3f2   :  { %1384 = vmatpush1.msra.mxu1 %v1320_v34  ;;  %v2631_v34 = vld [vmem:[%s4781_s8 + $0x138] sm:$0xff] }
 0x3f3   :  { %1389 = vmatprep.subr.mxu1 %v2908_v5 }
 0x3f4   :  { %1390 = vmatpush2.msra.mxu1 %v1349_v1  ;;  %v2630_v1 = vld [vmem:[%s4781_s8 + $0x130] sm:$0xff] }
 0x3f5   :  { %1391 = vmatprep.subr.mxu1 %v2908_v5 }
 0x3fa   :  { %v1088_v2 = vpop.f32.mrf.mxu0 }
 0x3fb   :  { %v1111_v52 = vadd.f32 %v1088_v2, %v967_v24  ;;  %v1348_v2 = vld [vmem:[%s4781_s8 + $0xe0] sm:$0xff] }
 0x3fc   :  { %v1090_v3 = vpop.f32.mrf.mxu0  ;;  %1392 = vmatpush2.msra.mxu1 %v1348_v2  ;;  %v2629_v2 = vld [vmem:[%s4781_s8 + $0x128] sm:$0xff] }
 0x3fd   :  { %v1112_v30 = vadd.f32 %v1090_v3, %v969_v50  ;;  %v3751_v33 = vadd.f32 %v1124_v7, %v1111_v52  ;;  %v1347_v3 = vld [vmem:[%s4781_s8 + $0xd8] sm:$0xff]  ;;  %1393 = vmatprep.subr.mxu1 %v2908_v5  ;;  %v1340_v50 = vld [vmem:[%s4781_s8 + $0xa0] sm:$0xff] }
 0x3fe   :  { %v1094_v8 = vpop.f32.mrf.mxu0  ;;  %1394 = vmatpush2.msra.mxu1 %v1347_v3  ;;  %v2628_v3 = vld [vmem:[%s4781_s8 + $0x120] sm:$0xff] }
 0x3ff   :  { %v1113_v23 = vadd.f32 %v1094_v8, %v973_v17  ;;  %v3756_v39 = vadd.f32 %v1128_v13, %v1112_v30  ;;  %v1139_v45 = vmax.f32 %v3751_v33, 0.0  ;;  %v1346_v8 = vld [vmem:[%s4781_s8 + $0xd0] sm:$0xff]  ;;  %1395 = vmatprep.subr.mxu1 %v2908_v5 }
 0x400   :  { %v1096_v12 = vpop.f32.mrf.mxu0  ;;  %1396 = vmatpush2.msra.mxu1 %v1346_v8  ;;  %v2626_v8 = vld [vmem:[%s4781_s8 + $0x110] sm:$0xff] }
 0x401   :  { %v1114_v56 = vadd.f32 %v1096_v12, %v975_v44  ;;  %v3739_v54 = vadd.f32 %v1124_v7, %v1113_v23  ;;  %v1140_v48 = vmax.f32 %v3756_v39, 0.0  ;;  %v1345_v12 = vld [vmem:[%s4781_s8 + $0xc8] sm:$0xff]  ;;  %1397 = vmatprep.subr.mxu1 %v2908_v5 }
 0x402   :  { %v1100_v38 = vpop.f32.mrf.mxu0  ;;  %1398 = vmatpush2.msra.mxu1 %v1345_v12  ;;  %v2624_v12 = vld [vmem:[%s4781_s8 + $0x100] sm:$0xff] }
 0x403   :  { %v1115_v10 = vadd.f32 %v1100_v38, %v979_v43  ;;  %v3746_v20 = vadd.f32 %v1128_v13, %v1114_v56  ;;  %v1141_v36 = vmax.f32 %v3739_v54, 0.0  ;;  %v1344_v38 = vld [vmem:[%s4781_s8 + $0xc0] sm:$0xff]  ;;  %1399 = vmatprep.subr.mxu1 %v2908_v5 }
 0x404   :  { %v1102_v16 = vpop.f32.mrf.mxu0  ;;  %1400 = vmatpush2.msra.mxu1 %v1344_v38  ;;  %v2651_v38 = vld [vmem:[%s4781_s8 + $0x1d8] sm:$0xff] }
 0x405   :  { %v3729_v47 = vadd.f32 %v1124_v7, %v1115_v10  ;;  %v1116_v49 = vadd.f32 %v1102_v16, %v981_v40  ;;  %v1142_v42 = vmax.f32 %v3746_v20, 0.0  ;;  %1401 = vmatprep.subr.mxu1 %v2908_v5  ;;  %v1339_v20 = vld [vmem:[%s4781_s8 + $0x98] sm:$0xff] }
 0x406   :  { %v1106_v21 = vpop.f32.mrf.mxu0 }
 0x407   :  { %v1143_v11 = vmax.f32 %v3729_v47, 0.0  ;;  %v3732_v15 = vadd.f32 %v1128_v13, %v1116_v49  ;;  %v1117_v58 = vadd.f32 %v1106_v21, %v985_v19  ;;  %v1342_v47 = vld [vmem:[%s4781_s8 + $0xb0] sm:$0xff] }
 0x408   :  { %v1108_v6 = vpop.f32.mrf.mxu0 }
 0x409   :  { %v1144_v59 = vmax.f32 %v3732_v15, 0.0  ;;  %v3735_v14 = vadd.f32 %v1124_v7, %v1117_v58  ;;  %v1118_v53 = vadd.f32 %v1108_v6, %v987_v46  ;;  %1163 = vrot.lane.b32.xlu1 %v1143_v11, %s2910_s6 }
 0x40b   :  { %v1145_v25 = vmax.f32 %v3735_v14, 0.0  ;;  %v3742_v27 = vadd.f32 %v1128_v13, %v1118_v53  ;;  %1165 = vrot.lane.b32.xlu0 %v1144_v59, %s2910_s6  ;;  %v1343_v13 = vld [vmem:[%s4781_s8 + $0xb8] sm:$0xff] }
 0x40c   :  { %1402 = vmatpush2.msra.mxu1 %v1343_v13  ;;  %v2647_v13 = vld [vmem:[%s4781_s8 + $0x1b8] sm:$0xff] }
 0x40d   :  { %v1146_v22 = vmax.f32 %v3742_v27, 0.0  ;;  %1167 = vrot.lane.b32.xlu1 %v1145_v25, %s2910_s6  ;;  %1403 = vmatprep.subr.mxu1 %v2908_v5 }
 0x40e   :  { %1404 = vmatpush2.msra.mxu1 %v1342_v47  ;;  %v2642_v47 = vld [vmem:[%s4781_s8 + $0x190] sm:$0xff] }
 0x40f   :  { %1169 = vrot.lane.b32.xlu0 %v1146_v22, %s2910_s6  ;;  %1405 = vmatprep.subr.mxu1 %v2908_v5 }
 0x411   :  { %1159 = vrot.lane.b32.xlu1 %v1141_v36, %s2910_s6 }
 0x413   :  { %1161 = vrot.lane.b32.xlu0 %v1142_v42, %s2910_s6 }
 0x415   :  { %1155 = vrot.lane.b32.xlu1 %v1139_v45, %s2910_s6 }
 0x417   :  { %1157 = vrot.lane.b32.xlu0 %v1140_v48, %s2910_s6 }
 0x47b   :  { %v1164_v4 = vpop.permute.xlu1 %1163 }
 0x47d   :  { %v1166_v9 = vpop.permute.xlu0 %1165 }
 0x47e   :  { %v1174_v41 = vsel %vm1171_vm7, %v1164_v4, %v1166_v9  ;;  %v1189_v40 = vmax.f32 %v1144_v59, %v1166_v9  ;;  %v2627_v4 = vld [vmem:[%s4781_s8 + $0x118] sm:$0xff]  ;;  %v2625_v9 = vld [vmem:[%s4781_s8 + $0x108] sm:$0xff] }
 0x47f   :  { %v1168_v43 = vpop.permute.xlu1 %1167  ;;  %v1188_v7 = vmax.f32 %v1143_v11, %v1174_v41  ;;  %v1341_v11 = vld [vmem:[%s4781_s8 + $0xa8] sm:$0xff]  ;;  %v2623_v41 = vld [vmem:[%s4781_s8 + $0xf8] sm:$0xff] }
 0x480   :  { %v1208_v49 = vrot.slane %v1189_v40, 1  ;;  %1406 = vmatpush2.msra.mxu1 %v1341_v11  ;;  %v1336_v11 = vld [vmem:[%s4781_s8 + $0x80] sm:$0xff] }
 0x481   :  { %v1170_v10 = vpop.permute.xlu0 %1169  ;;  %v1206_v46 = vrot.slane %v1188_v7, 1  ;;  %1407 = vmatprep.subr.mxu1 %v2908_v5 }
 0x482   :  { %v1175_v16 = vsel %vm1171_vm7, %v1168_v43, %v1170_v10  ;;  %v1191_v17 = vmax.f32 %v1146_v22, %v1170_v10  ;;  %1408 = vmatpush2.msra.mxu1 %v1340_v50  ;;  %v2622_v43 = vld [vmem:[%s4781_s8 + $0xf0] sm:$0xff]  ;;  %v2648_v10 = vld [vmem:[%s4781_s8 + $0x1c0] sm:$0xff] }
 0x483   :  { %v1190_v18 = vmax.f32 %v1145_v25, %v1175_v16  ;;  %v1160_v19 = vpop.permute.xlu1 %1159  ;;  %1409 = vmatprep.subr.mxu1 %v2908_v5  ;;  %v2646_v16 = vld [vmem:[%s4781_s8 + $0x1b0] sm:$0xff] }
 0x484   :  { %v1212_v44 = vrot.slane %v1191_v17, 1  ;;  %1410 = vmatpush2.msra.mxu1 %v1339_v20  ;;  %v2665_v20 = vld [vmem:[%s4781_s8 + $0x228] sm:$0xff] }
 0x485   :  { %v1210_v21 = vrot.slane %v1190_v18, 1  ;;  %v1162_v23 = vpop.permute.xlu0 %1161  ;;  %1411 = vmatprep.subr.mxu1 %v2908_v5 }
 0x486   :  { %v1213_v15 = vsel %vm346_vm3, %v1208_v49, %v1212_v44  ;;  %v3878_v58 = vmax.f32 %v1191_v17, %v1212_v44  ;;  %v1173_v24 = vsel %vm1171_vm7, %v1160_v19, %v1162_v23  ;;  %v1187_v6 = vmax.f32 %v1142_v42, %v1162_v23  ;;  %1412 = vmatpush2.msra.mxu1 %v1338_v26  ;;  %v2645_v17 = vld [vmem:[%s4781_s8 + $0x1a8] sm:$0xff]  ;;  %v2643_v19 = vld [vmem:[%s4781_s8 + $0x198] sm:$0xff]  ;;  %v2640_v44 = vld [vmem:[%s4781_s8 + $0x180] sm:$0xff] }
 0x487   :  { %v1211_v56 = vsel %vm346_vm3, %v1206_v46, %v1210_v21  ;;  %v3884_v59 = vmax.f32 %v1189_v40, %v1213_v15  ;;  %v3886_v14 = vmax.f32 %v1190_v18, %v1210_v21  ;;  %v1186_v53 = vmax.f32 %v1141_v36, %v1173_v24  ;;  %v1156_v30 = vpop.permute.xlu1 %1155  ;;  %1413 = vmatprep.subr.mxu1 %v2908_v5  ;;  %v2650_v40 = vld [vmem:[%s4781_s8 + $0x1d0] sm:$0xff]  ;;  %v2644_v18 = vld [vmem:[%s4781_s8 + $0x1a0] sm:$0xff]  ;;  %v1337_v21 = vld [vmem:[%s4781_s8 + $0x88] sm:$0xff] }
 0x488   :  { %v3894_v52 = vmax.f32 %v1188_v7, %v1211_v56  ;;  %v1204_v25 = vrot.slane %v1187_v6, 1  ;;  %2615 = vmatprep.subr.msk.mxu0 %vm346_vm3, %v3878_v58  ;;  %v2649_v7 = vld [vmem:[%s4781_s8 + $0x1c8] sm:$0xff]  ;;  %v2638_v23 = vld [vmem:[%s4781_s8 + $0x170] sm:$0xff]  ;;  %1414 = vmatpush2.msra.mxu1 %v1337_v21  ;;  %v2660_v26 = vld [vmem:[%s4781_s8 + $0x200] sm:$0xff] }
 0x489   :  { %v1201_v27 = vrot.slane %v1186_v53, 1  ;;  %2616 = vmatpush1.msk.msra.mxu0 %vm346_vm3, %v3886_v14  ;;  %v1158_v54 = vpop.permute.xlu0 %1157  ;;  %1415 = vmatprep.subr.mxu1 %v2908_v5  ;;  %v2670_v56 = vld [vmem:[%s4781_s8 + $0x250] sm:$0xff]  ;;  %v2672_v21 = vld [vmem:[%s4781_s8 + $0x260] sm:$0xff] }
 0x48a   :  { %v1209_v22 = vsel %vm346_vm3, %v1204_v25, %v1208_v49  ;;  %v1172_v36 = vsel %vm1171_vm7, %v1156_v30, %v1158_v54  ;;  %v1185_v42 = vmax.f32 %v1140_v48, %v1158_v54  ;;  %1275 = vmatprep.subr.mxu0 %v3884_v59  ;;  %v2641_v49 = vld [vmem:[%s4781_s8 + $0x188] sm:$0xff]  ;;  %1416 = vmatpush2.msra.mxu1 %v1336_v11  ;;  %v2667_v30 = vld [vmem:[%s4781_s8 + $0x238] sm:$0xff]  ;;  %v2666_v54 = vld [vmem:[%s4781_s8 + $0x230] sm:$0xff] }
 0x48b   :  { %v1207_v51 = vsel %vm346_vm3, %v1201_v27, %v1206_v46  ;;  %v3910_v29 = vmax.f32 %v1187_v6, %v1209_v22  ;;  %v1184_v31 = vmax.f32 %v1139_v45, %v1172_v36  ;;  %1276 = vmatpush1.msra.mxu0 %v3894_v52  ;;  %v2639_v46 = vld [vmem:[%s4781_s8 + $0x178] sm:$0xff]  ;;  %1713 = vmatprep.subr.mxu1 %v2908_v5  ;;  %v2664_v22 = vld [vmem:[%s4781_s8 + $0x220] sm:$0xff]  ;;  %v2717_v11 = vld [vmem:[%s4781_s8 + $0x3a8] sm:$0xff] }
 0x48c   :  { %v3919_v39 = vmax.f32 %v1186_v53, %v1207_v51  ;;  %v1203_v48 = vrot.slane %v1185_v42, 1  ;;  %v2671_v6 = vld [vmem:[%s4781_s8 + $0x258] sm:$0xff]  ;;  %v2669_v53 = vld [vmem:[%s4781_s8 + $0x248] sm:$0xff]  ;;  %v1604_v36 = vld [vmem:[%s4780_s7 + $0x4] sm:$0x3] }
 0x48d   :  { %v1200_v28 = vrot.slane %v1184_v31, 1  ;;  %1277 = vmatprep.subr.mxu0 %v3910_v29  ;;  %v2662_v51 = vld [vmem:[%s4781_s8 + $0x210] sm:$0xff] }
 0x48e   :  { %v1205_v33 = vsel %vm346_vm3, %v1203_v48, %v1204_v25  ;;  %1278 = vmatpush1.msra.mxu0 %v3919_v39  ;;  %v2668_v25 = vld [vmem:[%s4781_s8 + $0x240] sm:$0xff] }
 0x48f   :  { %v1202_v45 = vsel %vm346_vm3, %v1200_v28, %v1201_v27  ;;  %v3926_v55 = vmax.f32 %v1185_v42, %v1205_v33  ;;  %v2663_v42 = vld [vmem:[%s4781_s8 + $0x218] sm:$0xff]  ;;  %v1784_v48 = vld [vmem:[%s4780_s7 + $0x6] sm:$0x3]  ;;  %v2705_v33 = vld [vmem:[%s4781_s8 + $0x348] sm:$0xff] }
 0x490   :  { %v3929_v57 = vmax.f32 %v1184_v31, %v1202_v45  ;;  %v2661_v31 = vld [vmem:[%s4781_s8 + $0x208] sm:$0xff]  ;;  %v2659_v28 = vld [vmem:[%s4781_s8 + $0x1f8] sm:$0xff]  ;;  %v2658_v45 = vld [vmem:[%s4781_s8 + $0x1f0] sm:$0xff] }
 0x491   :  { %1279 = vmatprep.subr.mxu0 %v3926_v55 }
 0x492   :  { %1280 = vmatpush1.msra.mxu0 %v3929_v57 }
 0x493   :  { %2617 = vmatmul.mubr.msk.f32.vlgmr.msra.gmra.mxu0 %vm1239_vm8, %v1238_v60  ;;  %2619 = vmatprep.subr.msk.mxu0 %vm346_vm3, %v3878_v58  ;;  %v2704_v60 = vld [vmem:[%s4781_s8 + $0x340] sm:$0xff] }
 0x494   :  { %2620 = vmatpush1.msk.msra.mxu0 %vm346_vm3, %v3886_v14  ;;  %1492 = vmatprep.mubr.f32.mxu0 %v2908_v5 }
 0x495   :  { %1454 = vmatprep.subr.mxu0 %v3884_v59 }
 0x496   :  { %1455 = vmatpush1.msra.mxu0 %v3894_v52 }
 0x497   :  { %1456 = vmatprep.subr.mxu0 %v3910_v29 }
 0x498   :  { %1457 = vmatpush1.msra.mxu0 %v3919_v39 }
 0x499   :  { %1458 = vmatprep.subr.mxu0 %v3926_v55 }
 0x49a   :  { %1459 = vmatpush1.msra.mxu0 %v3929_v57 }
 0x49b   :  { %2621 = vmatmul.mubr.msk.f32.vlgmr.msra.gmra.mxu0 %vm1239_vm8, %v1424_v61  ;;  %1533 = vmatprep.subr.mxu0 %v2908_v5  ;;  %v2657_v61 = vld [vmem:[%s4781_s8 + $0x1e8] sm:$0xff] }
 0x49c   :  { %1534 = vmatpush1.msra.mxu0 %v2637_v62  ;;  %v2703_v62 = vld [vmem:[%s4781_s8 + $0x338] sm:$0xff] }
 0x49d   :  { %1535 = vmatprep.subr.mxu0 %v2908_v5 }
 0x49e   :  { %1536 = vmatpush1.msra.mxu0 %v2636_v63  ;;  %v2656_v63 = vld [vmem:[%s4781_s8 + $0x1e0] sm:$0xff] }
 0x49f   :  { %1537 = vmatprep.subr.mxu0 %v2908_v5 }
 0x4a0   :  { %1538 = vmatpush1.msra.mxu0 %v2635_v0  ;;  %v2702_v0 = vld [vmem:[%s4781_s8 + $0x330] sm:$0xff] }
 0x4a1   :  { %1539 = vmatprep.subr.mxu0 %v2908_v5 }
 0x4a2   :  { %1540 = vmatpush1.msra.mxu0 %v2634_v35  ;;  %v2685_v35 = vld [vmem:[%s4781_s8 + $0x2c8] sm:$0xff] }
 0x4a3   :  { %1541 = vmatprep.subr.mxu0 %v2908_v5 }
 0x4a4   :  { %1542 = vmatpush1.msra.mxu0 %v2633_v37  ;;  %v2701_v37 = vld [vmem:[%s4781_s8 + $0x328] sm:$0xff] }
 0x4a5   :  { %1543 = vmatprep.subr.mxu0 %v2908_v5 }
 0x4a6   :  { %1544 = vmatpush1.msra.mxu0 %v2632_v32  ;;  %v2684_v32 = vld [vmem:[%s4781_s8 + $0x2c0] sm:$0xff] }
 0x4a7   :  { %1545 = vmatprep.subr.mxu0 %v2908_v5 }
 0x4a8   :  { %1546 = vmatpush1.msra.mxu0 %v2631_v34  ;;  %v2700_v34 = vld [vmem:[%s4781_s8 + $0x320] sm:$0xff] }
 0x4a9   :  { %1547 = vmatprep.subr.mxu0 %v2908_v5 }
 0x4aa   :  { %1548 = vmatpush1.msra.mxu0 %v2630_v1  ;;  %v2683_v1 = vld [vmem:[%s4781_s8 + $0x2b8] sm:$0xff] }
 0x4ab   :  { %1549 = vmatprep.subr.mxu0 %v2908_v5 }
 0x4ac   :  { %1550 = vmatpush1.msra.mxu0 %v2629_v2  ;;  %v2699_v2 = vld [vmem:[%s4781_s8 + $0x318] sm:$0xff] }
 0x4ad   :  { %1551 = vmatprep.subr.mxu0 %v2908_v5 }
 0x4ae   :  { %1552 = vmatpush1.msra.mxu0 %v2628_v3  ;;  %v2682_v3 = vld [vmem:[%s4781_s8 + $0x2b0] sm:$0xff] }
 0x4af   :  { %1553 = vmatprep.subr.mxu0 %v2908_v5 }
 0x4b0   :  { %1554 = vmatpush1.msra.mxu0 %v2627_v4  ;;  %v2698_v4 = vld [vmem:[%s4781_s8 + $0x310] sm:$0xff] }
 0x4b1   :  { %1555 = vmatprep.subr.mxu0 %v2908_v5 }
 0x4b2   :  { %1556 = vmatpush1.msra.mxu0 %v2626_v8  ;;  %v2681_v8 = vld [vmem:[%s4781_s8 + $0x2a8] sm:$0xff] }
 0x4b3   :  { %1557 = vmatprep.subr.mxu0 %v2908_v5 }
 0x4b4   :  { %1558 = vmatpush1.msra.mxu0 %v2625_v9  ;;  %v2697_v9 = vld [vmem:[%s4781_s8 + $0x308] sm:$0xff] }
 0x4b5   :  { %1559 = vmatprep.subr.mxu0 %v2908_v5 }
 0x4b6   :  { %1560 = vmatpush1.msra.mxu0 %v2624_v12  ;;  %v2680_v12 = vld [vmem:[%s4781_s8 + $0x2a0] sm:$0xff] }
 0x4b7   :  { %1561 = vmatprep.subr.mxu0 %v2908_v5 }
 0x4b8   :  { %1562 = vmatpush1.msra.mxu0 %v2623_v41  ;;  %v2696_v41 = vld [vmem:[%s4781_s8 + $0x300] sm:$0xff] }
 0x4b9   :  { %1563 = vmatprep.subr.mxu0 %v2908_v5 }
 0x4ba   :  { %1564 = vmatpush1.msra.mxu0 %v2622_v43  ;;  %v2679_v43 = vld [vmem:[%s4781_s8 + $0x298] sm:$0xff] }
 0x4bb   :  { %1569 = vmatprep.subr.mxu0 %v2908_v5 }
 0x4bc   :  { %1570 = vmatpush2.msra.mxu0 %v2651_v38  ;;  %v2695_v38 = vld [vmem:[%s4781_s8 + $0x2f8] sm:$0xff] }
 0x4bd   :  { %1571 = vmatprep.subr.mxu0 %v2908_v5 }
 0x4be   :  { %1572 = vmatpush2.msra.mxu0 %v2650_v40  ;;  %v2678_v40 = vld [vmem:[%s4781_s8 + $0x290] sm:$0xff] }
 0x4bf   :  { %1573 = vmatprep.subr.mxu0 %v2908_v5 }
 0x4c0   :  { %1574 = vmatpush2.msra.mxu0 %v2649_v7  ;;  %v2694_v7 = vld [vmem:[%s4781_s8 + $0x2f0] sm:$0xff] }
 0x4c1   :  { %1575 = vmatprep.subr.mxu0 %v2908_v5 }
 0x4c2   :  { %1576 = vmatpush2.msra.mxu0 %v2648_v10  ;;  %v2677_v10 = vld [vmem:[%s4781_s8 + $0x288] sm:$0xff] }
 0x4c3   :  { %1577 = vmatprep.subr.mxu0 %v2908_v5 }
 0x4c4   :  { %1578 = vmatpush2.msra.mxu0 %v2647_v13  ;;  %v2693_v13 = vld [vmem:[%s4781_s8 + $0x2e8] sm:$0xff] }
 0x4c5   :  { %1579 = vmatprep.subr.mxu0 %v2908_v5 }
 0x4c6   :  { %1580 = vmatpush2.msra.mxu0 %v2646_v16  ;;  %v2676_v16 = vld [vmem:[%s4781_s8 + $0x280] sm:$0xff] }
 0x4c7   :  { %1581 = vmatprep.subr.mxu0 %v2908_v5 }
 0x4c8   :  { %1582 = vmatpush2.msra.mxu0 %v2645_v17  ;;  %v2692_v17 = vld [vmem:[%s4781_s8 + $0x2e0] sm:$0xff] }
 0x4c9   :  { %1583 = vmatprep.subr.mxu0 %v2908_v5 }
 0x4ca   :  { %1584 = vmatpush2.msra.mxu0 %v2644_v18  ;;  %v2675_v18 = vld [vmem:[%s4781_s8 + $0x278] sm:$0xff] }
 0x4cb   :  { %1585 = vmatprep.subr.mxu0 %v2908_v5 }
 0x4cc   :  { %1586 = vmatpush2.msra.mxu0 %v2643_v19  ;;  %v2691_v19 = vld [vmem:[%s4781_s8 + $0x2d8] sm:$0xff] }
 0x4cd   :  { %1587 = vmatprep.subr.mxu0 %v2908_v5 }
 0x4ce   :  { %1588 = vmatpush2.msra.mxu0 %v2642_v47  ;;  %v2674_v47 = vld [vmem:[%s4781_s8 + $0x270] sm:$0xff] }
 0x4cf   :  { %1589 = vmatprep.subr.mxu0 %v2908_v5 }
 0x4d0   :  { %1590 = vmatpush2.msra.mxu0 %v2641_v49  ;;  %v2690_v49 = vld [vmem:[%s4781_s8 + $0x2d0] sm:$0xff] }
 0x4d1   :  { %1591 = vmatprep.subr.mxu0 %v2908_v5 }
 0x4d2   :  { %1592 = vmatpush2.msra.mxu0 %v2640_v44  ;;  %v2673_v44 = vld [vmem:[%s4781_s8 + $0x268] sm:$0xff] }
 0x4d3   :  { %1593 = vmatprep.subr.mxu0 %v2908_v5 }
 0x4d4   :  { %1594 = vmatpush2.msra.mxu0 %v2639_v46  ;;  %v2719_v46 = vld [vmem:[%s4781_s8 + $0x3b8] sm:$0xff] }
 0x4d5   :  { %1595 = vmatprep.subr.mxu0 %v2908_v5 }
 0x4d6   :  { %1596 = vmatpush2.msra.mxu0 %v2638_v23  ;;  %v2718_v23 = vld [vmem:[%s4781_s8 + $0x3b0] sm:$0xff] }
 0x4d7   :  { %2653 = vmatprep.subr.msk.mxu0 %vm346_vm3, %v3878_v58 }
 0x553   :  { %v1315_v15 = vpop.f32.mrf.mxu0 }
 0x555   :  { %v1317_v24 = vpop.f32.mrf.mxu0 }
 0x556   :  { %2618 = vmatprep.mubr.msk.f32.mxu1 %vm1171_vm7, %v1317_v24  ;;  %v2715_v24 = vld [vmem:[%s4781_s8 + $0x398] sm:$0xff] }
 0x557   :  { %1418 = vmatmul.mubr.f32.vlgmr.msra.gmra.mxu1 %v1315_v15  ;;  %v2716_v15 = vld [vmem:[%s4781_s8 + $0x3a0] sm:$0xff] }
 0x558   :  { %1714 = vmatpush1.msra.mxu1 %v2671_v6  ;;  %v2714_v6 = vld [vmem:[%s4781_s8 + $0x390] sm:$0xff] }
 0x559   :  { %1715 = vmatprep.subr.mxu1 %v2908_v5 }
 0x55a   :  { %1716 = vmatpush1.msra.mxu1 %v2670_v56  ;;  %v2713_v56 = vld [vmem:[%s4781_s8 + $0x388] sm:$0xff] }
 0x55b   :  { %1717 = vmatprep.subr.mxu1 %v2908_v5  ;;  %v1494_v50 = vpop.f32.mrf.mxu0 }
 0x55c   :  { %1718 = vmatpush1.msra.mxu1 %v2669_v53  ;;  %v2712_v53 = vld [vmem:[%s4781_s8 + $0x380] sm:$0xff] }
 0x55d   :  { %1719 = vmatprep.subr.mxu1 %v2908_v5  ;;  %v1496_v27 = vpop.f32.mrf.mxu0 }
 0x55e   :  { %1720 = vmatpush1.msra.mxu1 %v2668_v25  ;;  %2652 = vmatprep.mubr.msk.f32.mxu0 %vm1171_vm7, %v1496_v27  ;;  %v2710_v25 = vld [vmem:[%s4781_s8 + $0x370] sm:$0xff]  ;;  %v2709_v27 = vld [vmem:[%s4781_s8 + $0x368] sm:$0xff] }
 0x55f   :  { %1721 = vmatprep.subr.mxu1 %v2908_v5  ;;  %1598 = vmatmul.mubr.f32.vlgmr.msra.gmra.mxu0 %v1494_v50  ;;  %v2711_v50 = vld [vmem:[%s4781_s8 + $0x378] sm:$0xff] }
 0x560   :  { %2654 = vmatpush1.msk.msra.mxu0 %vm346_vm3, %v3886_v14  ;;  %1722 = vmatpush1.msra.mxu1 %v2667_v30  ;;  %v2708_v30 = vld [vmem:[%s4781_s8 + $0x360] sm:$0xff] }
 0x561   :  { %1634 = vmatprep.subr.mxu0 %v3884_v59  ;;  %1723 = vmatprep.subr.mxu1 %v2908_v5 }
 0x562   :  { %1635 = vmatpush1.msra.mxu0 %v3894_v52  ;;  %1724 = vmatpush1.msra.mxu1 %v2666_v54  ;;  %v2707_v54 = vld [vmem:[%s4781_s8 + $0x358] sm:$0xff] }
 0x563   :  { %1636 = vmatprep.subr.mxu0 %v3910_v29  ;;  %1725 = vmatprep.subr.mxu1 %v2908_v5 }
 0x564   :  { %1637 = vmatpush1.msra.mxu0 %v3919_v39  ;;  %1726 = vmatpush1.msra.mxu1 %v2665_v20  ;;  %v2706_v20 = vld [vmem:[%s4781_s8 + $0x350] sm:$0xff] }
 0x565   :  { %1638 = vmatprep.subr.mxu0 %v3926_v55  ;;  %1727 = vmatprep.subr.mxu1 %v2908_v5 }
 0x566   :  { %1639 = vmatpush1.msra.mxu0 %v3929_v57  ;;  %1672 = vmatprep.mubr.f32.mxu0 %v2908_v5 }
 0x567   :  { %1728 = vmatpush1.msra.mxu1 %v2664_v22  ;;  %2655 = vmatmul.mubr.msk.f32.vlgmr.msra.gmra.mxu0 %vm1239_vm8, %v1604_v36 }
 0x568   :  { %1729 = vmatprep.subr.mxu1 %v2908_v5  ;;  %2687 = vmatprep.subr.msk.mxu0 %vm346_vm3, %v3878_v58 }
 0x569   :  { %1730 = vmatpush1.msra.mxu1 %v2663_v42  ;;  %2688 = vmatpush1.msk.msra.mxu0 %vm346_vm3, %v3886_v14  ;;  %v2614_v42 = vld [vmem:[%s4782_s9] ss:$0 sm:$0xff] }
 0x56a   :  { %1731 = vmatprep.subr.mxu1 %v2908_v5  ;;  %1814 = vmatprep.subr.mxu0 %v3884_v59 }
 0x56b   :  { %1732 = vmatpush1.msra.mxu1 %v2662_v51  ;;  %1815 = vmatpush1.msra.mxu0 %v3894_v52 }
 0x56c   :  { %1733 = vmatprep.subr.mxu1 %v2908_v5  ;;  %1816 = vmatprep.subr.mxu0 %v3910_v29 }
 0x56d   :  { %1734 = vmatpush1.msra.mxu1 %v2661_v31  ;;  %1817 = vmatpush1.msra.mxu0 %v3919_v39 }
 0x56e   :  { %1735 = vmatprep.subr.mxu1 %v2908_v5  ;;  %1818 = vmatprep.subr.mxu0 %v3926_v55 }
 0x56f   :  { %1736 = vmatpush1.msra.mxu1 %v2660_v26  ;;  %1819 = vmatpush1.msra.mxu0 %v3929_v57 }
 0x570   :  { %1852 = vmatprep.mubr.f32.mxu0 %v2908_v5  ;;  %1737 = vmatprep.subr.mxu1 %v2908_v5 }
 0x571   :  { %2689 = vmatmul.mubr.msk.f32.vlgmr.msra.gmra.mxu0 %vm1239_vm8, %v1784_v48  ;;  %1893 = vmatprep.subr.mxu0 %v2908_v5 }
 0x572   :  { %1738 = vmatpush1.msra.mxu1 %v2659_v28  ;;  %1894 = vmatpush1.msra.mxu0 %v2705_v33 }
 0x573   :  { %1739 = vmatprep.subr.mxu1 %v2908_v5  ;;  %1895 = vmatprep.subr.mxu0 %v2908_v5 }
 0x574   :  { %1740 = vmatpush1.msra.mxu1 %v2658_v45  ;;  %1896 = vmatpush1.msra.mxu0 %v2704_v60  ;;  %v1964_v45 = vld [vmem:[%s4780_s7 + $0x8] sm:$0x3] }
 0x575   :  { %1741 = vmatprep.subr.mxu1 %v2908_v5  ;;  %1897 = vmatprep.subr.mxu0 %v2908_v5 }
 0x576   :  { %1742 = vmatpush1.msra.mxu1 %v2657_v61  ;;  %1898 = vmatpush1.msra.mxu0 %v2703_v62  ;;  %v2739_v61 = vld [vmem:[%s4781_s8 + $0x438] sm:$0xff] }
 0x577   :  { %1743 = vmatprep.subr.mxu1 %v2908_v5  ;;  %1899 = vmatprep.subr.mxu0 %v2908_v5 }
 0x578   :  { %1744 = vmatpush1.msra.mxu1 %v2656_v63  ;;  %1900 = vmatpush1.msra.mxu0 %v2702_v0  ;;  %v2738_v63 = vld [vmem:[%s4781_s8 + $0x430] sm:$0xff]  ;;  %v2737_v0 = vld [vmem:[%s4781_s8 + $0x428] sm:$0xff] }
 0x579   :  { %1749 = vmatprep.subr.mxu1 %v2908_v5  ;;  %1901 = vmatprep.subr.mxu0 %v2908_v5 }
 0x57a   :  { %1750 = vmatpush2.msra.mxu1 %v2685_v35  ;;  %1902 = vmatpush1.msra.mxu0 %v2701_v37  ;;  %v2736_v35 = vld [vmem:[%s4781_s8 + $0x420] sm:$0xff]  ;;  %v2144_v37 = vld [vmem:[%s4780_s7 + $0xa] sm:$0x3] }
 0x57b   :  { %1751 = vmatprep.subr.mxu1 %v2908_v5  ;;  %1903 = vmatprep.subr.mxu0 %v2908_v5 }
 0x57c   :  { %1752 = vmatpush2.msra.mxu1 %v2684_v32  ;;  %1904 = vmatpush1.msra.mxu0 %v2700_v34  ;;  %v2735_v32 = vld [vmem:[%s4781_s8 + $0x418] sm:$0xff]  ;;  %v2734_v34 = vld [vmem:[%s4781_s8 + $0x410] sm:$0xff] }
 0x57d   :  { %1753 = vmatprep.subr.mxu1 %v2908_v5  ;;  %1905 = vmatprep.subr.mxu0 %v2908_v5 }
 0x57e   :  { %1754 = vmatpush2.msra.mxu1 %v2683_v1  ;;  %1906 = vmatpush1.msra.mxu0 %v2699_v2  ;;  %v2773_v1 = vld [vmem:[%s4781_s8 + $0x528] sm:$0xff] }
 0x57f   :  { %1755 = vmatprep.subr.mxu1 %v2908_v5  ;;  %1907 = vmatprep.subr.mxu0 %v2908_v5  ;;  %v2733_v2 = vld [vmem:[%s4781_s8 + $0x408] sm:$0xff] }
 0x580   :  { %1756 = vmatpush2.msra.mxu1 %v2682_v3  ;;  %1908 = vmatpush1.msra.mxu0 %v2698_v4  ;;  %v2772_v3 = vld [vmem:[%s4781_s8 + $0x520] sm:$0xff] }
 0x581   :  { %1757 = vmatprep.subr.mxu1 %v2908_v5  ;;  %1909 = vmatprep.subr.mxu0 %v2908_v5  ;;  %v2732_v4 = vld [vmem:[%s4781_s8 + $0x400] sm:$0xff] }
 0x582   :  { %1758 = vmatpush2.msra.mxu1 %v2681_v8  ;;  %1910 = vmatpush1.msra.mxu0 %v2697_v9  ;;  %v2771_v8 = vld [vmem:[%s4781_s8 + $0x518] sm:$0xff] }
 0x583   :  { %1759 = vmatprep.subr.mxu1 %v2908_v5  ;;  %1911 = vmatprep.subr.mxu0 %v2908_v5  ;;  %v2731_v9 = vld [vmem:[%s4781_s8 + $0x3f8] sm:$0xff] }
 0x584   :  { %1760 = vmatpush2.msra.mxu1 %v2680_v12  ;;  %1912 = vmatpush1.msra.mxu0 %v2696_v41  ;;  %v2770_v12 = vld [vmem:[%s4781_s8 + $0x510] sm:$0xff] }
 0x585   :  { %1761 = vmatprep.subr.mxu1 %v2908_v5  ;;  %1913 = vmatprep.subr.mxu0 %v2908_v5  ;;  %v2730_v41 = vld [vmem:[%s4781_s8 + $0x3f0] sm:$0xff] }
 0x586   :  { %1762 = vmatpush2.msra.mxu1 %v2679_v43  ;;  %1914 = vmatpush1.msra.mxu0 %v2695_v38  ;;  %v2769_v43 = vld [vmem:[%s4781_s8 + $0x508] sm:$0xff] }
 0x587   :  { %1763 = vmatprep.subr.mxu1 %v2908_v5  ;;  %1915 = vmatprep.subr.mxu0 %v2908_v5  ;;  %v2729_v38 = vld [vmem:[%s4781_s8 + $0x3e8] sm:$0xff] }
 0x588   :  { %1764 = vmatpush2.msra.mxu1 %v2678_v40  ;;  %1916 = vmatpush1.msra.mxu0 %v2694_v7  ;;  %v2768_v40 = vld [vmem:[%s4781_s8 + $0x500] sm:$0xff] }
 0x589   :  { %1765 = vmatprep.subr.mxu1 %v2908_v5  ;;  %1917 = vmatprep.subr.mxu0 %v2908_v5  ;;  %v2728_v7 = vld [vmem:[%s4781_s8 + $0x3e0] sm:$0xff] }
 0x58a   :  { %1766 = vmatpush2.msra.mxu1 %v2677_v10  ;;  %1918 = vmatpush1.msra.mxu0 %v2693_v13  ;;  %v2767_v10 = vld [vmem:[%s4781_s8 + $0x4f8] sm:$0xff] }
 0x58b   :  { %1767 = vmatprep.subr.mxu1 %v2908_v5  ;;  %1919 = vmatprep.subr.mxu0 %v2908_v5  ;;  %v2727_v13 = vld [vmem:[%s4781_s8 + $0x3d8] sm:$0xff] }
 0x58c   :  { %1768 = vmatpush2.msra.mxu1 %v2676_v16  ;;  %1920 = vmatpush1.msra.mxu0 %v2692_v17  ;;  %v2766_v16 = vld [vmem:[%s4781_s8 + $0x4f0] sm:$0xff] }
 0x58d   :  { %1769 = vmatprep.subr.mxu1 %v2908_v5  ;;  %1921 = vmatprep.subr.mxu0 %v2908_v5  ;;  %v2726_v17 = vld [vmem:[%s4781_s8 + $0x3d0] sm:$0xff] }
 0x58e   :  { %1770 = vmatpush2.msra.mxu1 %v2675_v18  ;;  %1922 = vmatpush1.msra.mxu0 %v2691_v19  ;;  %v2765_v18 = vld [vmem:[%s4781_s8 + $0x4e8] sm:$0xff] }
 0x58f   :  { %1771 = vmatprep.subr.mxu1 %v2908_v5  ;;  %1923 = vmatprep.subr.mxu0 %v2908_v5  ;;  %v2725_v19 = vld [vmem:[%s4781_s8 + $0x3c8] sm:$0xff] }
 0x590   :  { %1772 = vmatpush2.msra.mxu1 %v2674_v47  ;;  %1924 = vmatpush1.msra.mxu0 %v2690_v49  ;;  %v2764_v47 = vld [vmem:[%s4781_s8 + $0x4e0] sm:$0xff] }
 0x591   :  { %1773 = vmatprep.subr.mxu1 %v2908_v5  ;;  %1929 = vmatprep.subr.mxu0 %v2908_v5  ;;  %v2724_v49 = vld [vmem:[%s4781_s8 + $0x3c0] sm:$0xff] }
 0x592   :  { %1774 = vmatpush2.msra.mxu1 %v2673_v44  ;;  %1930 = vmatpush2.msra.mxu0 %v2719_v46  ;;  %v2763_v44 = vld [vmem:[%s4781_s8 + $0x4d8] sm:$0xff]  ;;  %v2753_v46 = vld [vmem:[%s4781_s8 + $0x4a8] sm:$0xff] }
 0x593   :  { %1775 = vmatprep.subr.mxu1 %v2908_v5  ;;  %1931 = vmatprep.subr.mxu0 %v2908_v5 }
 0x594   :  { %1776 = vmatpush2.msra.mxu1 %v2672_v21  ;;  %1932 = vmatpush2.msra.mxu0 %v2718_v23  ;;  %v2762_v21 = vld [vmem:[%s4781_s8 + $0x4d0] sm:$0xff]  ;;  %v2752_v23 = vld [vmem:[%s4781_s8 + $0x4a0] sm:$0xff] }
 0x595   :  { %1933 = vmatprep.subr.mxu0 %v2908_v5  ;;  %2721 = vmatprep.subr.msk.mxu1 %vm346_vm3, %v3878_v58 }
 0x596   :  { %1934 = vmatpush2.msra.mxu0 %v2717_v11  ;;  %v2761_v11 = vld [vmem:[%s4781_s8 + $0x4c8] sm:$0xff] }
 0x597   :  { %1935 = vmatprep.subr.mxu0 %v2908_v5 }
 0x598   :  { %1936 = vmatpush2.msra.mxu0 %v2716_v15  ;;  %v2751_v15 = vld [vmem:[%s4781_s8 + $0x498] sm:$0xff] }
 0x599   :  { %1937 = vmatprep.subr.mxu0 %v2908_v5 }
 0x59a   :  { %1938 = vmatpush2.msra.mxu0 %v2715_v24  ;;  %v2760_v24 = vld [vmem:[%s4781_s8 + $0x4c0] sm:$0xff] }
 0x59b   :  { %1939 = vmatprep.subr.mxu0 %v2908_v5 }
 0x59c   :  { %1940 = vmatpush2.msra.mxu0 %v2714_v6  ;;  %v2750_v6 = vld [vmem:[%s4781_s8 + $0x490] sm:$0xff] }
 0x59d   :  { %1941 = vmatprep.subr.mxu0 %v2908_v5 }
 0x59e   :  { %1942 = vmatpush2.msra.mxu0 %v2713_v56  ;;  %v2759_v56 = vld [vmem:[%s4781_s8 + $0x4b8] sm:$0xff] }
 0x59f   :  { %1943 = vmatprep.subr.mxu0 %v2908_v5 }
 0x5a0   :  { %1944 = vmatpush2.msra.mxu0 %v2712_v53  ;;  %v2749_v53 = vld [vmem:[%s4781_s8 + $0x488] sm:$0xff] }
 0x5a1   :  { %1945 = vmatprep.subr.mxu0 %v2908_v5 }
 0x5a2   :  { %1946 = vmatpush2.msra.mxu0 %v2711_v50  ;;  %v2758_v50 = vld [vmem:[%s4781_s8 + $0x4b0] sm:$0xff] }
 0x5a3   :  { %1947 = vmatprep.subr.mxu0 %v2908_v5 }
 0x5a4   :  { %1948 = vmatpush2.msra.mxu0 %v2710_v25  ;;  %v2748_v25 = vld [vmem:[%s4781_s8 + $0x480] sm:$0xff] }
 0x5a5   :  { %1949 = vmatprep.subr.mxu0 %v2908_v5 }
 0x5a6   :  { %1950 = vmatpush2.msra.mxu0 %v2709_v27  ;;  %v2787_v27 = vld [vmem:[%s4781_s8 + $0x598] sm:$0xff] }
 0x5a7   :  { %1951 = vmatprep.subr.mxu0 %v2908_v5 }
 0x5a8   :  { %1952 = vmatpush2.msra.mxu0 %v2708_v30  ;;  %v2747_v30 = vld [vmem:[%s4781_s8 + $0x478] sm:$0xff] }
 0x5a9   :  { %1953 = vmatprep.subr.mxu0 %v2908_v5 }
 0x5aa   :  { %1954 = vmatpush2.msra.mxu0 %v2707_v54  ;;  %v2786_v54 = vld [vmem:[%s4781_s8 + $0x590] sm:$0xff] }
 0x5ab   :  { %1955 = vmatprep.subr.mxu0 %v2908_v5 }
 0x5ac   :  { %1956 = vmatpush2.msra.mxu0 %v2706_v20  ;;  %v2746_v20 = vld [vmem:[%s4781_s8 + $0x470] sm:$0xff] }
 0x5ad   :  { %2755 = vmatprep.subr.msk.mxu0 %vm346_vm3, %v3878_v58 }
 0x617   :  { %v1419_v22 = vpop.f32.mrf.mxu1 }
 0x618   :  { %v1423_v51 = vadd.f32 %v2614_v42, %v1419_v22  ;;  %v2785_v22 = vld [vmem:[%s4781_s8 + $0x588] sm:$0xff]  ;;  %v2784_v42 = vld [vmem:[%s4781_s8 + $0x580] sm:$0xff] }
 0x619   :  { %v1421_v36 = vpop.f32.mrf.mxu1 }
 0x61a   :  { %v2745_v36 = vld [vmem:[%s4781_s8 + $0x468] sm:$0xff] }
 0x61f   :  { %v1599_v31 = vpop.f32.mrf.mxu0 }
 0x620   :  { %v4358_v26 = vadd.f32 %v1599_v31, %v1423_v51  ;;  %v2744_v51 = vld [vmem:[%s4781_s8 + $0x460] sm:$0xff]  ;;  %v2743_v31 = vld [vmem:[%s4781_s8 + $0x458] sm:$0xff] }
 0x621   :  { %v1601_v48 = vpop.f32.mrf.mxu0 }
 0x622   :  { %v2742_v48 = vld [vmem:[%s4781_s8 + $0x450] sm:$0xff] }
 0x627   :  { %v1674_v28 = vpop.f32.mrf.mxu0 }
 0x629   :  { %v1676_v33 = vpop.f32.mrf.mxu0 }
 0x62a   :  { %2686 = vmatprep.mubr.msk.f32.mxu1 %vm1171_vm7, %v1676_v33  ;;  %v2740_v33 = vld [vmem:[%s4781_s8 + $0x440] sm:$0xff] }
 0x62b   :  { %1778 = vmatmul.mubr.f32.vlgmr.msra.gmra.mxu1 %v1674_v28  ;;  %v2741_v28 = vld [vmem:[%s4781_s8 + $0x448] sm:$0xff] }
 0x62c   :  { %2722 = vmatpush1.msk.msra.mxu1 %vm346_vm3, %v3886_v14  ;;  %2032 = vmatprep.mubr.f32.mxu1 %v2908_v5 }
 0x62d   :  { %1994 = vmatprep.subr.mxu1 %v3884_v59 }
 0x62e   :  { %1995 = vmatpush1.msra.mxu1 %v3894_v52 }
 0x62f   :  { %1996 = vmatprep.subr.mxu1 %v3910_v29 }
 0x630   :  { %1997 = vmatpush1.msra.mxu1 %v3919_v39 }
 0x631   :  { %v1854_v60 = vpop.f32.mrf.mxu0  ;;  %1998 = vmatprep.subr.mxu1 %v3926_v55 }
 0x632   :  { %1999 = vmatpush1.msra.mxu1 %v3929_v57 }
 0x633   :  { %v1856_v62 = vpop.f32.mrf.mxu0  ;;  %2723 = vmatmul.mubr.msk.f32.vlgmr.msra.gmra.mxu1 %vm1239_vm8, %v1964_v45  ;;  %2073 = vmatprep.subr.mxu1 %v2908_v5  ;;  %v2783_v45 = vld [vmem:[%s4781_s8 + $0x578] sm:$0xff] }
 0x634   :  { %2720 = vmatprep.mubr.msk.f32.mxu0 %vm1171_vm7, %v1856_v62  ;;  %2074 = vmatpush1.msra.mxu1 %v2739_v61  ;;  %v2781_v61 = vld [vmem:[%s4781_s8 + $0x568] sm:$0xff]  ;;  %v2780_v62 = vld [vmem:[%s4781_s8 + $0x560] sm:$0xff] }
 0x635   :  { %1958 = vmatmul.mubr.f32.vlgmr.msra.gmra.mxu0 %v1854_v60  ;;  %2075 = vmatprep.subr.mxu1 %v2908_v5  ;;  %v2782_v60 = vld [vmem:[%s4781_s8 + $0x570] sm:$0xff] }
 0x636   :  { %2756 = vmatpush1.msk.msra.mxu0 %vm346_vm3, %v3886_v14  ;;  %2076 = vmatpush1.msra.mxu1 %v2738_v63  ;;  %v2779_v63 = vld [vmem:[%s4781_s8 + $0x558] sm:$0xff] }
 0x637   :  { %2174 = vmatprep.subr.mxu0 %v3884_v59  ;;  %2077 = vmatprep.subr.mxu1 %v2908_v5 }
 0x638   :  { %2175 = vmatpush1.msra.mxu0 %v3894_v52  ;;  %2078 = vmatpush1.msra.mxu1 %v2737_v0  ;;  %v2777_v0 = vld [vmem:[%s4781_s8 + $0x548] sm:$0xff] }
 0x639   :  { %2176 = vmatprep.subr.mxu0 %v3910_v29  ;;  %2079 = vmatprep.subr.mxu1 %v2908_v5 }
 0x63a   :  { %2177 = vmatpush1.msra.mxu0 %v3919_v39  ;;  %2080 = vmatpush1.msra.mxu1 %v2736_v35  ;;  %v2776_v35 = vld [vmem:[%s4781_s8 + $0x540] sm:$0xff] }
 0x63b   :  { %2178 = vmatprep.subr.mxu0 %v3926_v55  ;;  %2212 = vmatprep.mubr.f32.mxu0 %v2908_v5 }
 0x63c   :  { %2179 = vmatpush1.msra.mxu0 %v3929_v57  ;;  %2081 = vmatprep.subr.mxu1 %v2908_v5 }
 0x63d   :  { %2757 = vmatmul.mubr.msk.f32.vlgmr.msra.gmra.mxu0 %vm1239_vm8, %v2144_v37  ;;  %2082 = vmatpush1.msra.mxu1 %v2735_v32  ;;  %v2775_v37 = vld [vmem:[%s4781_s8 + $0x538] sm:$0xff]  ;;  %v2774_v32 = vld [vmem:[%s4781_s8 + $0x530] sm:$0xff] }
 0x63e   :  { %2083 = vmatprep.subr.mxu1 %v2908_v5  ;;  %2253 = vmatprep.subr.mxu0 %v2908_v5 }
 0x63f   :  { %2084 = vmatpush1.msra.mxu1 %v2734_v34  ;;  %2254 = vmatpush1.msra.mxu0 %v2773_v1 }
 0x640   :  { %2085 = vmatprep.subr.mxu1 %v2908_v5  ;;  %2255 = vmatprep.subr.mxu0 %v2908_v5 }
 0x641   :  { %2086 = vmatpush1.msra.mxu1 %v2733_v2  ;;  %2256 = vmatpush1.msra.mxu0 %v2772_v3 }
 0x642   :  { %2087 = vmatprep.subr.mxu1 %v2908_v5  ;;  %2257 = vmatprep.subr.mxu0 %v2908_v5 }
 0x643   :  { %2088 = vmatpush1.msra.mxu1 %v2732_v4  ;;  %2258 = vmatpush1.msra.mxu0 %v2771_v8 }
 0x644   :  { %2089 = vmatprep.subr.mxu1 %v2908_v5  ;;  %2259 = vmatprep.subr.mxu0 %v2908_v5 }
 0x645   :  { %2090 = vmatpush1.msra.mxu1 %v2731_v9  ;;  %2260 = vmatpush1.msra.mxu0 %v2770_v12 }
 0x646   :  { %2091 = vmatprep.subr.mxu1 %v2908_v5  ;;  %2261 = vmatprep.subr.mxu0 %v2908_v5 }
 0x647   :  { %2092 = vmatpush1.msra.mxu1 %v2730_v41  ;;  %2262 = vmatpush1.msra.mxu0 %v2769_v43  ;;  %v2801_v43 = vld [vmem:[%s4781_s8 + $0x5e8] sm:$0xff] }
 0x648   :  { %2093 = vmatprep.subr.mxu1 %v2908_v5  ;;  %2263 = vmatprep.subr.mxu0 %v2908_v5 }
 0x649   :  { %2094 = vmatpush1.msra.mxu1 %v2729_v38  ;;  %2264 = vmatpush1.msra.mxu0 %v2768_v40  ;;  %v2800_v38 = vld [vmem:[%s4781_s8 + $0x5e0] sm:$0xff]  ;;  %v2799_v40 = vld [vmem:[%s4781_s8 + $0x5d8] sm:$0xff] }
 0x64a   :  { %2095 = vmatprep.subr.mxu1 %v2908_v5  ;;  %2265 = vmatprep.subr.mxu0 %v2908_v5 }
 0x64b   :  { %2096 = vmatpush1.msra.mxu1 %v2728_v7  ;;  %2266 = vmatpush1.msra.mxu0 %v2767_v10  ;;  %v2798_v7 = vld [vmem:[%s4781_s8 + $0x5d0] sm:$0xff]  ;;  %v2797_v10 = vld [vmem:[%s4781_s8 + $0x5c8] sm:$0xff] }
 0x64c   :  { %2097 = vmatprep.subr.mxu1 %v2908_v5  ;;  %2267 = vmatprep.subr.mxu0 %v2908_v5 }
 0x64d   :  { %2098 = vmatpush1.msra.mxu1 %v2727_v13  ;;  %2268 = vmatpush1.msra.mxu0 %v2766_v16  ;;  %v2796_v13 = vld [vmem:[%s4781_s8 + $0x5c0] sm:$0xff]  ;;  %v2795_v16 = vld [vmem:[%s4781_s8 + $0x5b8] sm:$0xff] }
 0x64e   :  { %2099 = vmatprep.subr.mxu1 %v2908_v5  ;;  %2269 = vmatprep.subr.mxu0 %v2908_v5 }
 0x64f   :  { %2100 = vmatpush1.msra.mxu1 %v2726_v17  ;;  %2270 = vmatpush1.msra.mxu0 %v2765_v18  ;;  %v2794_v17 = vld [vmem:[%s4781_s8 + $0x5b0] sm:$0xff]  ;;  %v2793_v18 = vld [vmem:[%s4781_s8 + $0x5a8] sm:$0xff] }
 0x650   :  { %2101 = vmatprep.subr.mxu1 %v2908_v5  ;;  %2271 = vmatprep.subr.mxu0 %v2908_v5 }
 0x651   :  { %2102 = vmatpush1.msra.mxu1 %v2725_v19  ;;  %2272 = vmatpush1.msra.mxu0 %v2764_v47  ;;  %v2792_v19 = vld [vmem:[%s4781_s8 + $0x5a0] sm:$0xff]  ;;  %v2821_v47 = vld [vmem:[%s4781_s8 + $0x688] sm:$0xff] }
 0x652   :  { %2103 = vmatprep.subr.mxu1 %v2908_v5  ;;  %2273 = vmatprep.subr.mxu0 %v2908_v5 }
 0x653   :  { %2104 = vmatpush1.msra.mxu1 %v2724_v49  ;;  %2274 = vmatpush1.msra.mxu0 %v2763_v44  ;;  %v2820_v49 = vld [vmem:[%s4781_s8 + $0x680] sm:$0xff]  ;;  %v2819_v44 = vld [vmem:[%s4781_s8 + $0x678] sm:$0xff] }
 0x654   :  { %2109 = vmatprep.subr.mxu1 %v2908_v5  ;;  %2275 = vmatprep.subr.mxu0 %v2908_v5 }
 0x655   :  { %2110 = vmatpush2.msra.mxu1 %v2753_v46  ;;  %2276 = vmatpush1.msra.mxu0 %v2762_v21  ;;  %v2818_v46 = vld [vmem:[%s4781_s8 + $0x670] sm:$0xff]  ;;  %v2817_v21 = vld [vmem:[%s4781_s8 + $0x668] sm:$0xff] }
 0x656   :  { %2111 = vmatprep.subr.mxu1 %v2908_v5  ;;  %2277 = vmatprep.subr.mxu0 %v2908_v5 }
 0x657   :  { %2112 = vmatpush2.msra.mxu1 %v2752_v23  ;;  %2278 = vmatpush1.msra.mxu0 %v2761_v11  ;;  %v2816_v23 = vld [vmem:[%s4781_s8 + $0x660] sm:$0xff]  ;;  %v2815_v11 = vld [vmem:[%s4781_s8 + $0x658] sm:$0xff] }
 0x658   :  { %2113 = vmatprep.subr.mxu1 %v2908_v5  ;;  %2279 = vmatprep.subr.mxu0 %v2908_v5 }
 0x659   :  { %2114 = vmatpush2.msra.mxu1 %v2751_v15  ;;  %2280 = vmatpush1.msra.mxu0 %v2760_v24  ;;  %v2814_v15 = vld [vmem:[%s4781_s8 + $0x650] sm:$0xff]  ;;  %v2813_v24 = vld [vmem:[%s4781_s8 + $0x648] sm:$0xff] }
 0x65a   :  { %2115 = vmatprep.subr.mxu1 %v2908_v5  ;;  %2281 = vmatprep.subr.mxu0 %v2908_v5 }
 0x65b   :  { %2116 = vmatpush2.msra.mxu1 %v2750_v6  ;;  %2282 = vmatpush1.msra.mxu0 %v2759_v56  ;;  %v2812_v6 = vld [vmem:[%s4781_s8 + $0x640] sm:$0xff]  ;;  %v2811_v56 = vld [vmem:[%s4781_s8 + $0x638] sm:$0xff] }
 0x65c   :  { %2117 = vmatprep.subr.mxu1 %v2908_v5  ;;  %2283 = vmatprep.subr.mxu0 %v2908_v5 }
 0x65d   :  { %2118 = vmatpush2.msra.mxu1 %v2749_v53  ;;  %2284 = vmatpush1.msra.mxu0 %v2758_v50  ;;  %v2810_v53 = vld [vmem:[%s4781_s8 + $0x630] sm:$0xff]  ;;  %v2809_v50 = vld [vmem:[%s4781_s8 + $0x628] sm:$0xff] }
 0x65e   :  { %2119 = vmatprep.subr.mxu1 %v2908_v5  ;;  %2289 = vmatprep.subr.mxu0 %v2908_v5 }
 0x65f   :  { %2120 = vmatpush2.msra.mxu1 %v2748_v25  ;;  %2290 = vmatpush2.msra.mxu0 %v2787_v27  ;;  %v2808_v25 = vld [vmem:[%s4781_s8 + $0x620] sm:$0xff] }
 0x660   :  { %2121 = vmatprep.subr.mxu1 %v2908_v5  ;;  %2291 = vmatprep.subr.mxu0 %v2908_v5 }
 0x661   :  { %2122 = vmatpush2.msra.mxu1 %v2747_v30  ;;  %2292 = vmatpush2.msra.mxu0 %v2786_v54 }
 0x662   :  { %2123 = vmatprep.subr.mxu1 %v2908_v5  ;;  %2293 = vmatprep.subr.mxu0 %v2908_v5 }
 0x663   :  { %2124 = vmatpush2.msra.mxu1 %v2746_v20  ;;  %2294 = vmatpush2.msra.mxu0 %v2785_v22 }
 0x664   :  { %2125 = vmatprep.subr.mxu1 %v2908_v5  ;;  %2295 = vmatprep.subr.mxu0 %v2908_v5 }
 0x665   :  { %2126 = vmatpush2.msra.mxu1 %v2745_v36  ;;  %2296 = vmatpush2.msra.mxu0 %v2784_v42 }
 0x666   :  { %2127 = vmatprep.subr.mxu1 %v2908_v5  ;;  %2297 = vmatprep.subr.mxu0 %v2908_v5 }
 0x667   :  { %2128 = vmatpush2.msra.mxu1 %v2744_v51  ;;  %2298 = vmatpush2.msra.mxu0 %v2783_v45 }
 0x668   :  { %2129 = vmatprep.subr.mxu1 %v2908_v5  ;;  %2299 = vmatprep.subr.mxu0 %v2908_v5 }
 0x669   :  { %2130 = vmatpush2.msra.mxu1 %v2743_v31  ;;  %2300 = vmatpush2.msra.mxu0 %v2782_v60 }
 0x66a   :  { %2131 = vmatprep.subr.mxu1 %v2908_v5  ;;  %2301 = vmatprep.subr.mxu0 %v2908_v5 }
 0x66b   :  { %2132 = vmatpush2.msra.mxu1 %v2742_v48  ;;  %2302 = vmatpush2.msra.mxu0 %v2781_v61 }
 0x66c   :  { %2133 = vmatprep.subr.mxu1 %v2908_v5  ;;  %2303 = vmatprep.subr.mxu0 %v2908_v5 }
 0x66d   :  { %2134 = vmatpush2.msra.mxu1 %v2741_v28  ;;  %2304 = vmatpush2.msra.mxu0 %v2780_v62 }
 0x66e   :  { %2135 = vmatprep.subr.mxu1 %v2908_v5  ;;  %2305 = vmatprep.subr.mxu0 %v2908_v5 }
 0x66f   :  { %2136 = vmatpush2.msra.mxu1 %v2740_v33  ;;  %2306 = vmatpush2.msra.mxu0 %v2779_v63 }
 0x670   :  { %2789 = vmatprep.subr.msk.mxu1 %vm346_vm3, %v3878_v58  ;;  %v2778_v58 = vld [vmem:[%s4781_s8 + $0x550] sm:$0xff]  ;;  %2307 = vmatprep.subr.mxu0 %v2908_v5 }
 0x671   :  { %2308 = vmatpush2.msra.mxu0 %v2778_v58 }
 0x672   :  { %2309 = vmatprep.subr.mxu0 %v2908_v5 }
 0x673   :  { %2310 = vmatpush2.msra.mxu0 %v2777_v0 }
 0x674   :  { %2311 = vmatprep.subr.mxu0 %v2908_v5 }
 0x675   :  { %2312 = vmatpush2.msra.mxu0 %v2776_v35 }
 0x676   :  { %2313 = vmatprep.subr.mxu0 %v2908_v5 }
 0x677   :  { %2314 = vmatpush2.msra.mxu0 %v2775_v37 }
 0x678   :  { %2315 = vmatprep.subr.mxu0 %v2908_v5 }
 0x679   :  { %2316 = vmatpush2.msra.mxu0 %v2774_v32 }
 0x6eb   :  { %v1779_v34 = vpop.f32.mrf.mxu1 }
 0x6ec   :  { %v1783_v1 = vadd.f32 %v1779_v34, %v4358_v26  ;;  %v2324_v26 = vld [vmem:[%s4780_s7 + $0xc] sm:$0x3] }
 0x6ed   :  { %v1781_v2 = vpop.f32.mrf.mxu1 }
 0x6f3   :  { %v2034_v3 = vpop.f32.mrf.mxu1 }
 0x6f5   :  { %v1959_v4 = vpop.f32.mrf.mxu0  ;;  %v2036_v8 = vpop.f32.mrf.mxu1 }
 0x6f6   :  { %v4631_v9 = vadd.f32 %v1959_v4, %v1783_v1  ;;  %2754 = vmatprep.mubr.msk.f32.mxu1 %vm1171_vm7, %v2036_v8 }
 0x6f7   :  { %2138 = vmatmul.mubr.f32.vlgmr.msra.gmra.mxu1 %v2034_v3  ;;  %v1961_v12 = vpop.f32.mrf.mxu0 }
 0x6f8   :  { %2790 = vmatpush1.msk.msra.mxu1 %vm346_vm3, %v3886_v14  ;;  %2392 = vmatprep.mubr.f32.mxu1 %v2908_v5  ;;  %v2807_v14 = vld [vmem:[%s4781_s8 + $0x618] sm:$0xff] }
 0x6f9   :  { %2354 = vmatprep.subr.mxu1 %v3884_v59 }
 0x6fa   :  { %2355 = vmatpush1.msra.mxu1 %v3894_v52  ;;  %v2806_v52 = vld [vmem:[%s4781_s8 + $0x610] sm:$0xff] }
 0x6fb   :  { %2356 = vmatprep.subr.mxu1 %v3910_v29  ;;  %v2805_v29 = vld [vmem:[%s4781_s8 + $0x608] sm:$0xff] }
 0x6fc   :  { %2357 = vmatpush1.msra.mxu1 %v3919_v39  ;;  %v2804_v39 = vld [vmem:[%s4781_s8 + $0x600] sm:$0xff] }
 0x6fd   :  { %v2214_v41 = vpop.f32.mrf.mxu0  ;;  %2358 = vmatprep.subr.mxu1 %v3926_v55  ;;  %v2803_v55 = vld [vmem:[%s4781_s8 + $0x5f8] sm:$0xff] }
 0x6fe   :  { %2359 = vmatpush1.msra.mxu1 %v3929_v57  ;;  %v2802_v57 = vld [vmem:[%s4781_s8 + $0x5f0] sm:$0xff]  ;;  %s2886_s8 = scalar_lea.vmem %s2512_s25, 32 }
 0x6ff   :  { %v2216_v59 = vpop.f32.mrf.mxu0  ;;  %2791 = vmatmul.mubr.msk.f32.vlgmr.msra.gmra.mxu1 %vm1239_vm8, %v2324_v26  ;;  %2433 = vmatprep.subr.mxu1 %v2908_v5  ;;  %p2887_p0 = scmp.ne.s32.totalorder %s2512_s25, %s2886_s8  ;;  %p2892_p2 = scmp.lt.s32.totalorder %s2886_s8, %s2886_s8 }
 0x700   :  { %2788 = vmatprep.mubr.msk.f32.mxu0 %vm1171_vm7, %v2216_v59  ;;  %2434 = vmatpush1.msra.mxu1 %v2807_v14 }
 0x701   :  { %2318 = vmatmul.mubr.f32.vlgmr.msra.gmra.mxu0 %v2214_v41  ;;  %2435 = vmatprep.subr.mxu1 %v2908_v5  ;;  %p2893_p3 = por %p2892_p2, %p2891_p1 }
 0x702   :  { %2436 = vmatpush1.msra.mxu1 %v2806_v52 }
 0x703   :  { %2437 = vmatprep.subr.mxu1 %v2908_v5  ;;  %p2894_p4 = pnand %p2893_p3, %p2887_p0 }
 0x704   :  { %2438 = vmatpush1.msra.mxu1 %v2805_v29 }
 0x705   :  { %2439 = vmatprep.subr.mxu1 %v2908_v5 }
 0x706   :  { %2440 = vmatpush1.msra.mxu1 %v2804_v39 }
 0x707   :  { %2441 = vmatprep.subr.mxu1 %v2908_v5 }
 0x708   :  { %2442 = vmatpush1.msra.mxu1 %v2803_v55 }
 0x709   :  { %2443 = vmatprep.subr.mxu1 %v2908_v5 }
 0x70a   :  { %2444 = vmatpush1.msra.mxu1 %v2802_v57 }
 0x70b   :  { %2445 = vmatprep.subr.mxu1 %v2908_v5 }
 0x70c   :  { %2446 = vmatpush1.msra.mxu1 %v2801_v43 }
 0x70d   :  { %2447 = vmatprep.subr.mxu1 %v2908_v5 }
 0x70e   :  { %2448 = vmatpush1.msra.mxu1 %v2800_v38 }
 0x70f   :  { %2449 = vmatprep.subr.mxu1 %v2908_v5 }
 0x710   :  { %2450 = vmatpush1.msra.mxu1 %v2799_v40 }
 0x711   :  { %2451 = vmatprep.subr.mxu1 %v2908_v5 }
 0x712   :  { %2452 = vmatpush1.msra.mxu1 %v2798_v7 }
 0x713   :  { %2453 = vmatprep.subr.mxu1 %v2908_v5 }
 0x714   :  { %2454 = vmatpush1.msra.mxu1 %v2797_v10 }
 0x715   :  { %2455 = vmatprep.subr.mxu1 %v2908_v5 }
 0x716   :  { %2456 = vmatpush1.msra.mxu1 %v2796_v13 }
 0x717   :  { %2457 = vmatprep.subr.mxu1 %v2908_v5 }
 0x718   :  { %2458 = vmatpush1.msra.mxu1 %v2795_v16 }
 0x719   :  { %2459 = vmatprep.subr.mxu1 %v2908_v5 }
 0x71a   :  { %2460 = vmatpush1.msra.mxu1 %v2794_v17 }
 0x71b   :  { %2461 = vmatprep.subr.mxu1 %v2908_v5 }
 0x71c   :  { %2462 = vmatpush1.msra.mxu1 %v2793_v18 }
 0x71d   :  { %2463 = vmatprep.subr.mxu1 %v2908_v5 }
 0x71e   :  { %2464 = vmatpush1.msra.mxu1 %v2792_v19 }
 0x71f   :  { %2469 = vmatprep.subr.mxu1 %v2908_v5 }
 0x720   :  { %2470 = vmatpush2.msra.mxu1 %v2821_v47 }
 0x721   :  { %2471 = vmatprep.subr.mxu1 %v2908_v5 }
 0x722   :  { %2472 = vmatpush2.msra.mxu1 %v2820_v49 }
 0x723   :  { %2473 = vmatprep.subr.mxu1 %v2908_v5 }
 0x724   :  { %2474 = vmatpush2.msra.mxu1 %v2819_v44 }
 0x725   :  { %2475 = vmatprep.subr.mxu1 %v2908_v5 }
 0x726   :  { %2476 = vmatpush2.msra.mxu1 %v2818_v46 }
 0x727   :  { %2477 = vmatprep.subr.mxu1 %v2908_v5 }
 0x728   :  { %2478 = vmatpush2.msra.mxu1 %v2817_v21 }
 0x729   :  { %2479 = vmatprep.subr.mxu1 %v2908_v5 }
 0x72a   :  { %2480 = vmatpush2.msra.mxu1 %v2816_v23 }
 0x72b   :  { %2481 = vmatprep.subr.mxu1 %v2908_v5 }
 0x72c   :  { %2482 = vmatpush2.msra.mxu1 %v2815_v11 }
 0x72d   :  { %2483 = vmatprep.subr.mxu1 %v2908_v5 }
 0x72e   :  { %2484 = vmatpush2.msra.mxu1 %v2814_v15 }
 0x72f   :  { %2485 = vmatprep.subr.mxu1 %v2908_v5 }
 0x730   :  { %2486 = vmatpush2.msra.mxu1 %v2813_v24 }
 0x731   :  { %2487 = vmatprep.subr.mxu1 %v2908_v5 }
 0x732   :  { %2488 = vmatpush2.msra.mxu1 %v2812_v6 }
 0x733   :  { %2489 = vmatprep.subr.mxu1 %v2908_v5 }
 0x734   :  { %2490 = vmatpush2.msra.mxu1 %v2811_v56 }
 0x735   :  { %2491 = vmatprep.subr.mxu1 %v2908_v5 }
 0x736   :  { %2492 = vmatpush2.msra.mxu1 %v2810_v53 }
 0x737   :  { %2493 = vmatprep.subr.mxu1 %v2908_v5 }
 0x738   :  { %2494 = vmatpush2.msra.mxu1 %v2809_v50 }
 0x739   :  { %2495 = vmatprep.subr.mxu1 %v2908_v5 }
 0x73a   :  { %2496 = vmatpush2.msra.mxu1 %v2808_v25 }
 0x7b7   :  { %v2139_v27 = vpop.f32.mrf.mxu1 }
 0x7b8   :  { %v2143_v30 = vadd.f32 %v2139_v27, %v4631_v9 }
 0x7b9   :  { %v2141_v54 = vpop.f32.mrf.mxu1 }
 0x7bf   :  { %v2394_v20 = vpop.f32.mrf.mxu1 }
 0x7c1   :  { %v2319_v22 = vpop.f32.mrf.mxu0  ;;  %v2396_v36 = vpop.f32.mrf.mxu1 }
 0x7c2   :  { %v2323_v42 = vadd.f32 %v2319_v22, %v2143_v30  ;;  %2822 = vmatprep.mubr.msk.f32.mxu1 %vm1171_vm7, %v2396_v36 }
 0x7c3   :  { %2498 = vmatmul.mubr.f32.vlgmr.msra.gmra.mxu1 %v2394_v20  ;;  %v2321_v51 = vpop.f32.mrf.mxu0 }
 0x883   :  { %v2499_v5 = vpop.f32.mrf.mxu1 }
 0x884   :  { %v2503_v31 = vadd.f32 %v2499_v5, %v2323_v42 }
 0x885   :  { %v2501_v48 = vpop.f32.mrf.mxu1 }
 0x886   :  { %2504 = vst [vmem:[#allocation2] sm:$0x3] %v2503_v31 }
 0x887   :  { %2897 = shalt.err (!%p2894_p4)
}
 0x888   :  { %2514 = dma.vmem_to_hbm [thread:$0]  %s2512_s25, 32, %s4783_s10, [#allocation3]  }
 0x889   :  { %2906 = dma.done.wait [#allocation3], 32  }
 0x88a   :  { %2907 = vsyncadd [#allocation3], 4294967264 }
 0x88b   :  { %2518 = vsyncpa [#allocation3], 1 }

</bundles_post_ra>
